<compile_context>
chip_gen: v6e
topology: v6e:2x2x1
jax: 0.10.0
libtpu: 0.0.40
codegen_flags: <defaults>
</compile_context>

<pallas_src>
import functools

import jax
import jax.numpy as jnp
import numpy as np
from jax.experimental import pallas as pl
from jax.experimental.pallas import tpu as pltpu


def _layer_norm(x, gamma, beta, eps=1e-5):
    mu = jnp.mean(x, axis=-1, keepdims=True)
    var = jnp.mean((x - mu) ** 2, axis=-1, keepdims=True)
    return (x - mu) * jax.lax.rsqrt(var + eps) * gamma + beta


def _t2v_layer_kernel(src_ref, pos_ref, kbias_ref,
                      wqk_ref, bqk_ref, wv_ref, bv_ref, wo_ref, bo_ref,
                      w1_ref, b1_ref, w2_ref, b2_ref,
                      g1_ref, be1_ref, g2_ref, be2_ref,
                      out_ref, *, vid_len, nhead):
    src = src_ref[...]            # (Bt, L, d) f32
    pos = pos_ref[...]            # (Bt, L, d) f32
    kbias = kbias_ref[...]        # (Bt, 1, Lk) f32 additive key-padding bias

    Bt, L, d = src.shape
    Lq = vid_len
    Lk = L - vid_len
    hd = d // nhead
    scale = 1.0 / float(np.sqrt(hd))
    bf = jnp.bfloat16

    # ---- fused Q/K projection over all L rows: one 2d-wide MXU pass ----
    ps = (src + pos).reshape(Bt * L, d).astype(bf)
    qk = jnp.dot(ps, wqk_ref[...], preferred_element_type=jnp.float32) + bqk_ref[...]
    qk = qk.reshape(Bt, L, 2 * d)
    q = qk[:, :Lq, :d].astype(bf)          # (Bt, Lq, d)
    k = qk[:, Lq:, d:].astype(bf)          # (Bt, Lk, d)

    # ---- V projection (raw src, text rows only) ----
    v_in = src[:, Lq:, :].reshape(Bt * Lk, d).astype(bf)
    v = jnp.dot(v_in, wv_ref[...], preferred_element_type=jnp.float32) + bv_ref[...]
    v = v.reshape(Bt, Lk, d).astype(bf)

    # ---- attention, batched over Bt; per-head output accumulated into the
    #      W_o projection: attn @ Wo == sum_h o_h @ Wo[h*hd:(h+1)*hd]  ----
    wo = wo_ref[...]
    acc = jnp.zeros((Bt * Lq, d), jnp.float32)
    for h in range(nhead):
        sl = slice(h * hd, (h + 1) * hd)
        s = jnp.einsum("bqe,bke->bqk", q[:, :, sl], k[:, :, sl],
                       preferred_element_type=jnp.float32) * scale + kbias
        s = s - jnp.max(s, axis=-1, keepdims=True)
        p = jnp.exp(s)
        p = p * pl.reciprocal(jnp.sum(p, axis=-1, keepdims=True), approx=True)
        o = jnp.einsum("bqk,bke->bqe", p.astype(bf), v[:, :, sl],
                       preferred_element_type=jnp.float32)        # (Bt, Lq, hd)
        acc = acc + jnp.dot(o.reshape(Bt * Lq, hd).astype(bf), wo[sl, :],
                            preferred_element_type=jnp.float32)
    attn = acc + bo_ref[...]                                      # (Bt*Lq, d)

    # ---- residual + norm + FFN + residual + norm (dropout == identity) ----
    src2 = src[:, :Lq, :].reshape(Bt * Lq, d) + attn
    src3 = _layer_norm(src2, g1_ref[...], be1_ref[...])
    h1 = jnp.maximum(
        jnp.dot(src3.astype(bf), w1_ref[...],
                preferred_element_type=jnp.float32) + b1_ref[...], 0.0)
    ffn = jnp.dot(h1.astype(bf), w2_ref[...],
                  preferred_element_type=jnp.float32) + b2_ref[...]
    out = _layer_norm(src2 + ffn, g2_ref[...], be2_ref[...])
    out_ref[...] = out.reshape(Bt, Lq, d)


def t2v_transformer_encoder_layer(src, src_mask, pos, params, *, vid_len, nhead,
                                  batch_tile=None):
    """src, pos: (L, B, d) float; src_mask: (B, L) bool (True == masked)."""
    L, B, d = src.shape
    if vid_len % 8 != 0:
        raise ValueError("vid_len must be a multiple of 8 (f32 sublane) for "
                         "aligned slices and the partial output block")
    if batch_tile is None:
        # Whole batch per grid step (fewest, biggest steps). On v7x with larger
        # B, pick batch_tile = B // 2 so the 'parallel' axis splits over 2 TCs.
        batch_tile = B
    assert B % batch_tile == 0
    Lk = L - vid_len

    src_b = jnp.transpose(src, (1, 0, 2)).astype(jnp.float32)
    pos_b = jnp.transpose(pos, (1, 0, 2)).astype(jnp.float32)
    # key-padding mask -> additive bias; km | (qm & km) == km, so qm is dropped.
    kbias = jnp.where(src_mask[:, vid_len:], jnp.float32(-1e30),
                      jnp.float32(0.0)).reshape(B, 1, Lk)

    bf = jnp.bfloat16
    f32 = jnp.float32
    wqk = jnp.concatenate([params["wq"], params["wk"]], axis=1).astype(bf)
    bqk = jnp.concatenate([params["bq"], params["bk"]], axis=1).astype(f32)
    param_list = [
        wqk, bqk,
        params["wv"].astype(bf), params["bv"].astype(f32),
        params["wo"].astype(bf), params["bo"].astype(f32),
        params["w1"].astype(bf), params["b1"].astype(f32),
        params["w2"].astype(bf), params["b2"].astype(f32),
        params["g1"].astype(f32), params["be1"].astype(f32),
        params["g2"].astype(f32), params["be2"].astype(f32),
    ]
    # NOTE(v7x VMEM budget): the replicated bf16 weights are double-buffered;
    # for large d_model / dim_feedforward budget ~2*2B*(4*d^2 + 2*d*ffn) bytes,
    # and raise pltpu.CompilerParams(vmem_limit_bytes=...) or tile the FFN.
    # At these shapes (<64 KiB of weights) the defaults are ample.

    def rep_spec(p):
        n = p.ndim
        return pl.BlockSpec(p.shape, lambda b, _n=n: (0,) * _n)

    in_specs = [
        pl.BlockSpec((batch_tile, L, d), lambda b: (b, 0, 0)),    # src (aliased)
        pl.BlockSpec((batch_tile, L, d), lambda b: (b, 0, 0)),    # pos
        pl.BlockSpec((batch_tile, 1, Lk), lambda b: (b, 0, 0)),   # mask bias
    ] + [rep_spec(p) for p in param_list]

    kernel = functools.partial(_t2v_layer_kernel, vid_len=vid_len, nhead=nhead)
    out = pl.pallas_call(
        kernel,
        out_shape=jax.ShapeDtypeStruct((B, L, d), jnp.float32),
        grid=(B // batch_tile,),
        in_specs=in_specs,
        # Only the video rows [0, vid_len) are written; rows [vid_len:) keep the
        # aliased src contents -> no passthrough copy and half the writeback.
        out_specs=pl.BlockSpec((batch_tile, vid_len, d), lambda b: (b, 0, 0)),
        input_output_aliases={0: 0},
        compiler_params=pltpu.CompilerParams(dimension_semantics=("parallel",)),
    )(src_b, pos_b, kbias, *param_list)
    return jnp.transpose(out, (1, 0, 2))


def init_params(key, d_model, nhead, dim_feedforward):
    """Deterministic synthetic params. Weights stored as (in, out) = W.T."""
    ks = jax.random.split(key, 16)
    s = 0.05
    n = jax.random.normal
    return {
        "wq": s * n(ks[0], (d_model, d_model), jnp.float32),
        "bq": s * n(ks[1], (1, d_model), jnp.float32),
        "wk": s * n(ks[2], (d_model, d_model), jnp.float32),
        "bk": s * n(ks[3], (1, d_model), jnp.float32),
        "wv": s * n(ks[4], (d_model, d_model), jnp.float32),
        "bv": s * n(ks[5], (1, d_model), jnp.float32),
        "wo": s * n(ks[6], (d_model, d_model), jnp.float32),
        "bo": s * n(ks[7], (1, d_model), jnp.float32),
        "w1": s * n(ks[8], (d_model, dim_feedforward), jnp.float32),
        "b1": s * n(ks[9], (1, dim_feedforward), jnp.float32),
        "w2": s * n(ks[10], (dim_feedforward, d_model), jnp.float32),
        "b2": s * n(ks[11], (1, d_model), jnp.float32),
        "g1": 1.0 + 0.1 * n(ks[12], (1, d_model), jnp.float32),
        "be1": 0.05 * n(ks[13], (1, d_model), jnp.float32),
        "g2": 1.0 + 0.1 * n(ks[14], (1, d_model), jnp.float32),
        "be2": 0.05 * n(ks[15], (1, d_model), jnp.float32),
    }


def ref_forward(src, src_mask, pos, p, vid_len, nhead):
    """Pure-JAX (f32) reference of forward_post (eval mode)."""
    L, B, d = src.shape
    hd = d // nhead
    ps = src + pos
    q, k, v = ps[:vid_len], ps[vid_len:], src[vid_len:]
    qp = q @ p["wq"] + p["bq"][0]
    kp = k @ p["wk"] + p["bk"][0]
    vp = v @ p["wv"] + p["bv"][0]

    def heads(x):  # (Ls, B, d) -> (B, h, Ls, hd)
        Ls = x.shape[0]
        return x.transpose(1, 0, 2).reshape(B, Ls, nhead, hd).transpose(0, 2, 1, 3)

    qh, kh, vh = heads(qp), heads(kp), heads(vp)
    scores = jnp.einsum("bhqe,bhke->bhqk", qh, kh) / np.sqrt(hd)
    km = src_mask[:, vid_len:][:, None, None, :]
    qm = src_mask[:, :vid_len][:, None, :, None]
    masked = km | (qm & km)
    scores = jnp.where(masked, -1e30, scores)
    attn = jax.nn.softmax(scores, axis=-1)
    o = jnp.einsum("bhqk,bhke->bhqe", attn, vh)
    o = o.transpose(0, 2, 1, 3).reshape(B, vid_len, d).transpose(1, 0, 2)
    o = o @ p["wo"] + p["bo"][0]
    src2 = src[:vid_len] + o
    s3 = _layer_norm(src2, p["g1"][0], p["be1"][0])
    s3 = jnp.maximum(s3 @ p["w1"] + p["b1"][0], 0.0) @ p["w2"] + p["b2"][0]
    src2 = _layer_norm(src2 + s3, p["g2"][0], p["be2"][0])
    return jnp.concatenate([src2, src[vid_len:]], axis=0)


if __name__ == "__main__":
    d_model, nhead, dim_feedforward = 64, 4, 128
    L, B, vid_len = 16, 2, 8

    key = jax.random.PRNGKey(0)
    k_src, k_pos, k_par = jax.random.split(key, 3)
    src = jax.random.normal(k_src, (L, B, d_model), jnp.float32)
    pos = jax.random.normal(k_pos, (L, B, d_model), jnp.float32)
    # True == masked (PyTorch key_padding_mask / bool attn_mask convention).
    src_mask = jnp.zeros((B, L), jnp.bool_)
    src_mask = src_mask.at[0, L - 1].set(True).at[0, 2].set(True).at[1, vid_len].set(True)

    params = init_params(k_par, d_model, nhead, dim_feedforward)

    fwd = jax.jit(functools.partial(t2v_transformer_encoder_layer,
                                    vid_len=vid_len, nhead=nhead))
    out = jax.block_until_ready(fwd(src, src_mask, pos, params))

    ref = ref_forward(src, src_mask, pos, params, vid_len, nhead)
    # bf16 MXU operands with f32 accumulation -> slightly looser tolerance.
    np.testing.assert_allclose(np.asarray(out), np.asarray(ref), rtol=3e-2, atol=3e-2)

    # TODO(synk): dropout (train mode) not implemented; kernel matches eval-mode forward.
    print("KERNEL_OK")
</pallas_src>

<mosaic_0001>
module attributes {stable_mosaic.version = 11 : i64} {
  func.func @_t2v_layer_kernel(%arg0: i32, %arg1: memref<2x16x64xf32, #tpu.memory_space<vmem>>, %arg2: memref<2x16x64xf32, #tpu.memory_space<vmem>>, %arg3: memref<2x1x8xf32, #tpu.memory_space<vmem>>, %arg4: memref<64x128xbf16, #tpu.memory_space<vmem>>, %arg5: memref<1x128xf32, #tpu.memory_space<vmem>>, %arg6: memref<64x64xbf16, #tpu.memory_space<vmem>>, %arg7: memref<1x64xf32, #tpu.memory_space<vmem>>, %arg8: memref<64x64xbf16, #tpu.memory_space<vmem>>, %arg9: memref<1x64xf32, #tpu.memory_space<vmem>>, %arg10: memref<64x128xbf16, #tpu.memory_space<vmem>>, %arg11: memref<1x128xf32, #tpu.memory_space<vmem>>, %arg12: memref<128x64xbf16, #tpu.memory_space<vmem>>, %arg13: memref<1x64xf32, #tpu.memory_space<vmem>>, %arg14: memref<1x64xf32, #tpu.memory_space<vmem>>, %arg15: memref<1x64xf32, #tpu.memory_space<vmem>>, %arg16: memref<1x64xf32, #tpu.memory_space<vmem>>, %arg17: memref<1x64xf32, #tpu.memory_space<vmem>>, %arg18: memref<2x8x64xf32, #tpu.memory_space<vmem>>) attributes {dimension_semantics = [#tpu.dimension_semantics<parallel>], iteration_bounds = array<i64: 1>, scalar_prefetch = 0 : i64, scratch_operands = 0 : i64, tpu.core_type = #tpu.core_type<tc>, window_params = [{transform_indices = @transform_0, window_bounds = array<i64: 2, 16, 64>}, {transform_indices = @transform_1, window_bounds = array<i64: 2, 16, 64>}, {transform_indices = @transform_2, window_bounds = array<i64: 2, 1, 8>}, {pipeline_mode = #tpu.pipeline_mode<synchronous>, transform_indices = @transform_3, window_bounds = array<i64: 64, 128>}, {pipeline_mode = #tpu.pipeline_mode<synchronous>, transform_indices = @transform_4, window_bounds = array<i64: 1, 128>}, {pipeline_mode = #tpu.pipeline_mode<synchronous>, transform_indices = @transform_5, window_bounds = array<i64: 64, 64>}, {pipeline_mode = #tpu.pipeline_mode<synchronous>, transform_indices = @transform_6, window_bounds = array<i64: 1, 64>}, {pipeline_mode = #tpu.pipeline_mode<synchronous>, transform_indices = @transform_7, window_bounds = array<i64: 64, 64>}, {pipeline_mode = #tpu.pipeline_mode<synchronous>, transform_indices = @transform_8, window_bounds = array<i64: 1, 64>}, {pipeline_mode = #tpu.pipeline_mode<synchronous>, transform_indices = @transform_9, window_bounds = array<i64: 64, 128>}, {pipeline_mode = #tpu.pipeline_mode<synchronous>, transform_indices = @transform_10, window_bounds = array<i64: 1, 128>}, {pipeline_mode = #tpu.pipeline_mode<synchronous>, transform_indices = @transform_11, window_bounds = array<i64: 128, 64>}, {pipeline_mode = #tpu.pipeline_mode<synchronous>, transform_indices = @transform_12, window_bounds = array<i64: 1, 64>}, {pipeline_mode = #tpu.pipeline_mode<synchronous>, transform_indices = @transform_13, window_bounds = array<i64: 1, 64>}, {pipeline_mode = #tpu.pipeline_mode<synchronous>, transform_indices = @transform_14, window_bounds = array<i64: 1, 64>}, {pipeline_mode = #tpu.pipeline_mode<synchronous>, transform_indices = @transform_15, window_bounds = array<i64: 1, 64>}, {pipeline_mode = #tpu.pipeline_mode<synchronous>, transform_indices = @transform_16, window_bounds = array<i64: 1, 64>}, {transform_indices = @transform_17, window_bounds = array<i64: 2, 8, 64>}]} {
    %c0 = arith.constant 0 : index
    %c0_0 = arith.constant 0 : index
    %c0_1 = arith.constant 0 : index
    %0 = vector.load %arg1[%c0, %c0_0, %c0_1] : memref<2x16x64xf32, #tpu.memory_space<vmem>>, vector<2x16x64xf32>
    %c0_2 = arith.constant 0 : index
    %c0_3 = arith.constant 0 : index
    %c0_4 = arith.constant 0 : index
    %1 = vector.load %arg2[%c0_2, %c0_3, %c0_4] : memref<2x16x64xf32, #tpu.memory_space<vmem>>, vector<2x16x64xf32>
    %c0_5 = arith.constant 0 : index
    %c0_6 = arith.constant 0 : index
    %c0_7 = arith.constant 0 : index
    %2 = vector.load %arg3[%c0_5, %c0_6, %c0_7] : memref<2x1x8xf32, #tpu.memory_space<vmem>>, vector<2x1x8xf32>
    %3 = arith.addf %0, %1 : vector<2x16x64xf32>
    %4 = vector.shape_cast %3 : vector<2x16x64xf32> to vector<32x64xf32>
    %5 = arith.truncf %4 : vector<32x64xf32> to vector<32x64xbf16>
    %c0_8 = arith.constant 0 : index
    %c0_9 = arith.constant 0 : index
    %6 = vector.load %arg4[%c0_8, %c0_9] : memref<64x128xbf16, #tpu.memory_space<vmem>>, vector<64x128xbf16>
    %cst = arith.constant dense<0.000000e+00> : vector<32x128xf32>
    %7 = tpu.matmul %5, %6, %cst {dimension_numbers = #tpu.dot_dimension_numbers<[1], [0], [0], [1], [0, 0, 1, 1], [], []>} : vector<32x64xbf16>, vector<64x128xbf16>, vector<32x128xf32> -> vector<32x128xf32>
    %c0_10 = arith.constant 0 : index
    %c0_11 = arith.constant 0 : index
    %8 = vector.load %arg5[%c0_10, %c0_11] : memref<1x128xf32, #tpu.memory_space<vmem>>, vector<1x128xf32>
    %9 = vector.broadcast %8 : vector<1x128xf32> to vector<32x128xf32>
    %10 = arith.addf %7, %9 : vector<32x128xf32>
    %11 = vector.shape_cast %10 : vector<32x128xf32> to vector<2x16x128xf32>
    %12 = vector.extract_strided_slice %11 {offsets = [0, 0, 0], sizes = [2, 8, 64], strides = [1, 1, 1]} : vector<2x16x128xf32> to vector<2x8x64xf32>
    %13 = arith.truncf %12 : vector<2x8x64xf32> to vector<2x8x64xbf16>
    %14 = vector.extract_strided_slice %11 {offsets = [0, 8, 64], sizes = [2, 8, 64], strides = [1, 1, 1]} : vector<2x16x128xf32> to vector<2x8x64xf32>
    %15 = arith.truncf %14 : vector<2x8x64xf32> to vector<2x8x64xbf16>
    %16 = vector.extract_strided_slice %0 {offsets = [0, 8, 0], sizes = [2, 8, 64], strides = [1, 1, 1]} : vector<2x16x64xf32> to vector<2x8x64xf32>
    %17 = vector.shape_cast %16 : vector<2x8x64xf32> to vector<16x64xf32>
    %18 = arith.truncf %17 : vector<16x64xf32> to vector<16x64xbf16>
    %c0_12 = arith.constant 0 : index
    %c0_13 = arith.constant 0 : index
    %19 = vector.load %arg6[%c0_12, %c0_13] : memref<64x64xbf16, #tpu.memory_space<vmem>>, vector<64x64xbf16>
    %cst_14 = arith.constant dense<0.000000e+00> : vector<16x64xf32>
    %20 = tpu.matmul %18, %19, %cst_14 {dimension_numbers = #tpu.dot_dimension_numbers<[1], [0], [0], [1], [0, 0, 1, 1], [], []>} : vector<16x64xbf16>, vector<64x64xbf16>, vector<16x64xf32> -> vector<16x64xf32>
    %c0_15 = arith.constant 0 : index
    %c0_16 = arith.constant 0 : index
    %21 = vector.load %arg7[%c0_15, %c0_16] : memref<1x64xf32, #tpu.memory_space<vmem>>, vector<1x64xf32>
    %22 = vector.broadcast %21 : vector<1x64xf32> to vector<16x64xf32>
    %23 = arith.addf %20, %22 : vector<16x64xf32>
    %24 = vector.shape_cast %23 : vector<16x64xf32> to vector<2x8x64xf32>
    %25 = arith.truncf %24 : vector<2x8x64xf32> to vector<2x8x64xbf16>
    %c0_17 = arith.constant 0 : index
    %c0_18 = arith.constant 0 : index
    %26 = vector.load %arg8[%c0_17, %c0_18] : memref<64x64xbf16, #tpu.memory_space<vmem>>, vector<64x64xbf16>
    %cst_19 = arith.constant 0.000000e+00 : f32
    %27 = vector.broadcast %cst_19 : f32 to vector<16x64xf32>
    %28 = vector.extract_strided_slice %13 {offsets = [0, 0, 0], sizes = [2, 8, 16], strides = [1, 1, 1]} : vector<2x8x64xbf16> to vector<2x8x16xbf16>
    %29 = vector.extract_strided_slice %15 {offsets = [0, 0, 0], sizes = [2, 8, 16], strides = [1, 1, 1]} : vector<2x8x64xbf16> to vector<2x8x16xbf16>
    "tpu.trace_start"() <{level = 10 : i32, message = "bqe,bke->bqk"}> : () -> ()
    %cst_20 = arith.constant dense<0.000000e+00> : vector<2x8x8xf32>
    %30 = tpu.matmul %28, %29, %cst_20 {dimension_numbers = #tpu.dot_dimension_numbers<[2], [2], [1], [1], [0, 0, 0, 1, 1, 1], [0], [0]>} : vector<2x8x16xbf16>, vector<2x8x16xbf16>, vector<2x8x8xf32> -> vector<2x8x8xf32>
    "tpu.trace_stop"() : () -> ()
    %cst_21 = arith.constant 2.500000e-01 : f32
    %31 = vector.broadcast %cst_21 : f32 to vector<2x8x8xf32>
    %32 = arith.mulf %30, %31 : vector<2x8x8xf32>
    %33 = vector.broadcast %2 : vector<2x1x8xf32> to vector<2x8x8xf32>
    %34 = arith.addf %32, %33 : vector<2x8x8xf32>
    %cst_22 = arith.constant dense<0xFF800000> : vector<2x8xf32>
    %35 = vector.multi_reduction <maximumf>, %34, %cst_22 [2] : vector<2x8x8xf32> to vector<2x8xf32>
    %36 = vector.shape_cast %35 : vector<2x8xf32> to vector<2x8x1xf32>
    %37 = vector.broadcast %36 : vector<2x8x1xf32> to vector<2x8x8xf32>
    %38 = arith.subf %34, %37 : vector<2x8x8xf32>
    %39 = math.exp %38 : vector<2x8x8xf32>
    %cst_23 = arith.constant dense<0.000000e+00> : vector<2x8xf32>
    %40 = vector.multi_reduction <add>, %39, %cst_23 [2] : vector<2x8x8xf32> to vector<2x8xf32>
    %41 = vector.shape_cast %40 : vector<2x8xf32> to vector<2x8x1xf32>
    %42 = tpu.reciprocal %41 {approx = true} : vector<2x8x1xf32> -> vector<2x8x1xf32>
    %43 = vector.broadcast %42 : vector<2x8x1xf32> to vector<2x8x8xf32>
    %44 = arith.mulf %39, %43 : vector<2x8x8xf32>
    %45 = arith.truncf %44 : vector<2x8x8xf32> to vector<2x8x8xbf16>
    %46 = vector.extract_strided_slice %25 {offsets = [0, 0, 0], sizes = [2, 8, 16], strides = [1, 1, 1]} : vector<2x8x64xbf16> to vector<2x8x16xbf16>
    "tpu.trace_start"() <{level = 10 : i32, message = "bqk,bke->bqe"}> : () -> ()
    %cst_24 = arith.constant dense<0.000000e+00> : vector<2x8x16xf32>
    %47 = tpu.matmul %45, %46, %cst_24 {dimension_numbers = #tpu.dot_dimension_numbers<[2], [1], [1], [2], [0, 0, 0, 1, 1, 2], [0], [0]>} : vector<2x8x8xbf16>, vector<2x8x16xbf16>, vector<2x8x16xf32> -> vector<2x8x16xf32>
    "tpu.trace_stop"() : () -> ()
    %48 = vector.shape_cast %47 : vector<2x8x16xf32> to vector<16x16xf32>
    %49 = arith.truncf %48 : vector<16x16xf32> to vector<16x16xbf16>
    %50 = vector.extract_strided_slice %26 {offsets = [0, 0], sizes = [16, 64], strides = [1, 1]} : vector<64x64xbf16> to vector<16x64xbf16>
    %cst_25 = arith.constant dense<0.000000e+00> : vector<16x64xf32>
    %51 = tpu.matmul %49, %50, %cst_25 {dimension_numbers = #tpu.dot_dimension_numbers<[1], [0], [0], [1], [0, 0, 1, 1], [], []>} : vector<16x16xbf16>, vector<16x64xbf16>, vector<16x64xf32> -> vector<16x64xf32>
    %52 = arith.addf %27, %51 : vector<16x64xf32>
    %53 = vector.extract_strided_slice %13 {offsets = [0, 0, 16], sizes = [2, 8, 16], strides = [1, 1, 1]} : vector<2x8x64xbf16> to vector<2x8x16xbf16>
    %54 = vector.extract_strided_slice %15 {offsets = [0, 0, 16], sizes = [2, 8, 16], strides = [1, 1, 1]} : vector<2x8x64xbf16> to vector<2x8x16xbf16>
    "tpu.trace_start"() <{level = 10 : i32, message = "bqe,bke->bqk"}> : () -> ()
    %cst_26 = arith.constant dense<0.000000e+00> : vector<2x8x8xf32>
    %55 = tpu.matmul %53, %54, %cst_26 {dimension_numbers = #tpu.dot_dimension_numbers<[2], [2], [1], [1], [0, 0, 0, 1, 1, 1], [0], [0]>} : vector<2x8x16xbf16>, vector<2x8x16xbf16>, vector<2x8x8xf32> -> vector<2x8x8xf32>
    "tpu.trace_stop"() : () -> ()
    %cst_27 = arith.constant 2.500000e-01 : f32
    %56 = vector.broadcast %cst_27 : f32 to vector<2x8x8xf32>
    %57 = arith.mulf %55, %56 : vector<2x8x8xf32>
    %58 = vector.broadcast %2 : vector<2x1x8xf32> to vector<2x8x8xf32>
    %59 = arith.addf %57, %58 : vector<2x8x8xf32>
    %cst_28 = arith.constant dense<0xFF800000> : vector<2x8xf32>
    %60 = vector.multi_reduction <maximumf>, %59, %cst_28 [2] : vector<2x8x8xf32> to vector<2x8xf32>
    %61 = vector.shape_cast %60 : vector<2x8xf32> to vector<2x8x1xf32>
    %62 = vector.broadcast %61 : vector<2x8x1xf32> to vector<2x8x8xf32>
    %63 = arith.subf %59, %62 : vector<2x8x8xf32>
    %64 = math.exp %63 : vector<2x8x8xf32>
    %cst_29 = arith.constant dense<0.000000e+00> : vector<2x8xf32>
    %65 = vector.multi_reduction <add>, %64, %cst_29 [2] : vector<2x8x8xf32> to vector<2x8xf32>
    %66 = vector.shape_cast %65 : vector<2x8xf32> to vector<2x8x1xf32>
    %67 = tpu.reciprocal %66 {approx = true} : vector<2x8x1xf32> -> vector<2x8x1xf32>
    %68 = vector.broadcast %67 : vector<2x8x1xf32> to vector<2x8x8xf32>
    %69 = arith.mulf %64, %68 : vector<2x8x8xf32>
    %70 = arith.truncf %69 : vector<2x8x8xf32> to vector<2x8x8xbf16>
    %71 = vector.extract_strided_slice %25 {offsets = [0, 0, 16], sizes = [2, 8, 16], strides = [1, 1, 1]} : vector<2x8x64xbf16> to vector<2x8x16xbf16>
    "tpu.trace_start"() <{level = 10 : i32, message = "bqk,bke->bqe"}> : () -> ()
    %cst_30 = arith.constant dense<0.000000e+00> : vector<2x8x16xf32>
    %72 = tpu.matmul %70, %71, %cst_30 {dimension_numbers = #tpu.dot_dimension_numbers<[2], [1], [1], [2], [0, 0, 0, 1, 1, 2], [0], [0]>} : vector<2x8x8xbf16>, vector<2x8x16xbf16>, vector<2x8x16xf32> -> vector<2x8x16xf32>
    "tpu.trace_stop"() : () -> ()
    %73 = vector.shape_cast %72 : vector<2x8x16xf32> to vector<16x16xf32>
    %74 = arith.truncf %73 : vector<16x16xf32> to vector<16x16xbf16>
    %75 = vector.extract_strided_slice %26 {offsets = [16, 0], sizes = [16, 64], strides = [1, 1]} : vector<64x64xbf16> to vector<16x64xbf16>
    %cst_31 = arith.constant dense<0.000000e+00> : vector<16x64xf32>
    %76 = tpu.matmul %74, %75, %cst_31 {dimension_numbers = #tpu.dot_dimension_numbers<[1], [0], [0], [1], [0, 0, 1, 1], [], []>} : vector<16x16xbf16>, vector<16x64xbf16>, vector<16x64xf32> -> vector<16x64xf32>
    %77 = arith.addf %52, %76 : vector<16x64xf32>
    %78 = vector.extract_strided_slice %13 {offsets = [0, 0, 32], sizes = [2, 8, 16], strides = [1, 1, 1]} : vector<2x8x64xbf16> to vector<2x8x16xbf16>
    %79 = vector.extract_strided_slice %15 {offsets = [0, 0, 32], sizes = [2, 8, 16], strides = [1, 1, 1]} : vector<2x8x64xbf16> to vector<2x8x16xbf16>
    "tpu.trace_start"() <{level = 10 : i32, message = "bqe,bke->bqk"}> : () -> ()
    %cst_32 = arith.constant dense<0.000000e+00> : vector<2x8x8xf32>
    %80 = tpu.matmul %78, %79, %cst_32 {dimension_numbers = #tpu.dot_dimension_numbers<[2], [2], [1], [1], [0, 0, 0, 1, 1, 1], [0], [0]>} : vector<2x8x16xbf16>, vector<2x8x16xbf16>, vector<2x8x8xf32> -> vector<2x8x8xf32>
    "tpu.trace_stop"() : () -> ()
    %cst_33 = arith.constant 2.500000e-01 : f32
    %81 = vector.broadcast %cst_33 : f32 to vector<2x8x8xf32>
    %82 = arith.mulf %80, %81 : vector<2x8x8xf32>
    %83 = vector.broadcast %2 : vector<2x1x8xf32> to vector<2x8x8xf32>
    %84 = arith.addf %82, %83 : vector<2x8x8xf32>
    %cst_34 = arith.constant dense<0xFF800000> : vector<2x8xf32>
    %85 = vector.multi_reduction <maximumf>, %84, %cst_34 [2] : vector<2x8x8xf32> to vector<2x8xf32>
    %86 = vector.shape_cast %85 : vector<2x8xf32> to vector<2x8x1xf32>
    %87 = vector.broadcast %86 : vector<2x8x1xf32> to vector<2x8x8xf32>
    %88 = arith.subf %84, %87 : vector<2x8x8xf32>
    %89 = math.exp %88 : vector<2x8x8xf32>
    %cst_35 = arith.constant dense<0.000000e+00> : vector<2x8xf32>
    %90 = vector.multi_reduction <add>, %89, %cst_35 [2] : vector<2x8x8xf32> to vector<2x8xf32>
    %91 = vector.shape_cast %90 : vector<2x8xf32> to vector<2x8x1xf32>
    %92 = tpu.reciprocal %91 {approx = true} : vector<2x8x1xf32> -> vector<2x8x1xf32>
    %93 = vector.broadcast %92 : vector<2x8x1xf32> to vector<2x8x8xf32>
    %94 = arith.mulf %89, %93 : vector<2x8x8xf32>
    %95 = arith.truncf %94 : vector<2x8x8xf32> to vector<2x8x8xbf16>
    %96 = vector.extract_strided_slice %25 {offsets = [0, 0, 32], sizes = [2, 8, 16], strides = [1, 1, 1]} : vector<2x8x64xbf16> to vector<2x8x16xbf16>
    "tpu.trace_start"() <{level = 10 : i32, message = "bqk,bke->bqe"}> : () -> ()
    %cst_36 = arith.constant dense<0.000000e+00> : vector<2x8x16xf32>
    %97 = tpu.matmul %95, %96, %cst_36 {dimension_numbers = #tpu.dot_dimension_numbers<[2], [1], [1], [2], [0, 0, 0, 1, 1, 2], [0], [0]>} : vector<2x8x8xbf16>, vector<2x8x16xbf16>, vector<2x8x16xf32> -> vector<2x8x16xf32>
    "tpu.trace_stop"() : () -> ()
    %98 = vector.shape_cast %97 : vector<2x8x16xf32> to vector<16x16xf32>
    %99 = arith.truncf %98 : vector<16x16xf32> to vector<16x16xbf16>
    %100 = vector.extract_strided_slice %26 {offsets = [32, 0], sizes = [16, 64], strides = [1, 1]} : vector<64x64xbf16> to vector<16x64xbf16>
    %cst_37 = arith.constant dense<0.000000e+00> : vector<16x64xf32>
    %101 = tpu.matmul %99, %100, %cst_37 {dimension_numbers = #tpu.dot_dimension_numbers<[1], [0], [0], [1], [0, 0, 1, 1], [], []>} : vector<16x16xbf16>, vector<16x64xbf16>, vector<16x64xf32> -> vector<16x64xf32>
    %102 = arith.addf %77, %101 : vector<16x64xf32>
    %103 = vector.extract_strided_slice %13 {offsets = [0, 0, 48], sizes = [2, 8, 16], strides = [1, 1, 1]} : vector<2x8x64xbf16> to vector<2x8x16xbf16>
    %104 = vector.extract_strided_slice %15 {offsets = [0, 0, 48], sizes = [2, 8, 16], strides = [1, 1, 1]} : vector<2x8x64xbf16> to vector<2x8x16xbf16>
    "tpu.trace_start"() <{level = 10 : i32, message = "bqe,bke->bqk"}> : () -> ()
    %cst_38 = arith.constant dense<0.000000e+00> : vector<2x8x8xf32>
    %105 = tpu.matmul %103, %104, %cst_38 {dimension_numbers = #tpu.dot_dimension_numbers<[2], [2], [1], [1], [0, 0, 0, 1, 1, 1], [0], [0]>} : vector<2x8x16xbf16>, vector<2x8x16xbf16>, vector<2x8x8xf32> -> vector<2x8x8xf32>
    "tpu.trace_stop"() : () -> ()
    %cst_39 = arith.constant 2.500000e-01 : f32
    %106 = vector.broadcast %cst_39 : f32 to vector<2x8x8xf32>
    %107 = arith.mulf %105, %106 : vector<2x8x8xf32>
    %108 = vector.broadcast %2 : vector<2x1x8xf32> to vector<2x8x8xf32>
    %109 = arith.addf %107, %108 : vector<2x8x8xf32>
    %cst_40 = arith.constant dense<0xFF800000> : vector<2x8xf32>
    %110 = vector.multi_reduction <maximumf>, %109, %cst_40 [2] : vector<2x8x8xf32> to vector<2x8xf32>
    %111 = vector.shape_cast %110 : vector<2x8xf32> to vector<2x8x1xf32>
    %112 = vector.broadcast %111 : vector<2x8x1xf32> to vector<2x8x8xf32>
    %113 = arith.subf %109, %112 : vector<2x8x8xf32>
    %114 = math.exp %113 : vector<2x8x8xf32>
    %cst_41 = arith.constant dense<0.000000e+00> : vector<2x8xf32>
    %115 = vector.multi_reduction <add>, %114, %cst_41 [2] : vector<2x8x8xf32> to vector<2x8xf32>
    %116 = vector.shape_cast %115 : vector<2x8xf32> to vector<2x8x1xf32>
    %117 = tpu.reciprocal %116 {approx = true} : vector<2x8x1xf32> -> vector<2x8x1xf32>
    %118 = vector.broadcast %117 : vector<2x8x1xf32> to vector<2x8x8xf32>
    %119 = arith.mulf %114, %118 : vector<2x8x8xf32>
    %120 = arith.truncf %119 : vector<2x8x8xf32> to vector<2x8x8xbf16>
    %121 = vector.extract_strided_slice %25 {offsets = [0, 0, 48], sizes = [2, 8, 16], strides = [1, 1, 1]} : vector<2x8x64xbf16> to vector<2x8x16xbf16>
    "tpu.trace_start"() <{level = 10 : i32, message = "bqk,bke->bqe"}> : () -> ()
    %cst_42 = arith.constant dense<0.000000e+00> : vector<2x8x16xf32>
    %122 = tpu.matmul %120, %121, %cst_42 {dimension_numbers = #tpu.dot_dimension_numbers<[2], [1], [1], [2], [0, 0, 0, 1, 1, 2], [0], [0]>} : vector<2x8x8xbf16>, vector<2x8x16xbf16>, vector<2x8x16xf32> -> vector<2x8x16xf32>
    "tpu.trace_stop"() : () -> ()
    %123 = vector.shape_cast %122 : vector<2x8x16xf32> to vector<16x16xf32>
    %124 = arith.truncf %123 : vector<16x16xf32> to vector<16x16xbf16>
    %125 = vector.extract_strided_slice %26 {offsets = [48, 0], sizes = [16, 64], strides = [1, 1]} : vector<64x64xbf16> to vector<16x64xbf16>
    %cst_43 = arith.constant dense<0.000000e+00> : vector<16x64xf32>
    %126 = tpu.matmul %124, %125, %cst_43 {dimension_numbers = #tpu.dot_dimension_numbers<[1], [0], [0], [1], [0, 0, 1, 1], [], []>} : vector<16x16xbf16>, vector<16x64xbf16>, vector<16x64xf32> -> vector<16x64xf32>
    %127 = arith.addf %102, %126 : vector<16x64xf32>
    %c0_44 = arith.constant 0 : index
    %c0_45 = arith.constant 0 : index
    %128 = vector.load %arg9[%c0_44, %c0_45] : memref<1x64xf32, #tpu.memory_space<vmem>>, vector<1x64xf32>
    %129 = vector.broadcast %128 : vector<1x64xf32> to vector<16x64xf32>
    %130 = arith.addf %127, %129 : vector<16x64xf32>
    %131 = vector.extract_strided_slice %0 {offsets = [0, 0, 0], sizes = [2, 8, 64], strides = [1, 1, 1]} : vector<2x16x64xf32> to vector<2x8x64xf32>
    %132 = vector.shape_cast %131 : vector<2x8x64xf32> to vector<16x64xf32>
    %133 = arith.addf %132, %130 : vector<16x64xf32>
    %c0_46 = arith.constant 0 : index
    %c0_47 = arith.constant 0 : index
    %134 = vector.load %arg14[%c0_46, %c0_47] : memref<1x64xf32, #tpu.memory_space<vmem>>, vector<1x64xf32>
    %c0_48 = arith.constant 0 : index
    %c0_49 = arith.constant 0 : index
    %135 = vector.load %arg15[%c0_48, %c0_49] : memref<1x64xf32, #tpu.memory_space<vmem>>, vector<1x64xf32>
    %cst_50 = arith.constant dense<0.000000e+00> : vector<16xf32>
    %136 = vector.multi_reduction <add>, %133, %cst_50 [1] : vector<16x64xf32> to vector<16xf32>
    %137 = vector.shape_cast %136 : vector<16xf32> to vector<16x1xf32>
    %cst_51 = arith.constant 6.400000e+01 : f32
    %138 = vector.broadcast %cst_51 : f32 to vector<16x1xf32>
    %139 = arith.divf %137, %138 : vector<16x1xf32>
    %140 = vector.broadcast %139 : vector<16x1xf32> to vector<16x64xf32>
    %141 = arith.subf %133, %140 : vector<16x64xf32>
    %142 = arith.mulf %141, %141 : vector<16x64xf32>
    %cst_52 = arith.constant dense<0.000000e+00> : vector<16xf32>
    %143 = vector.multi_reduction <add>, %142, %cst_52 [1] : vector<16x64xf32> to vector<16xf32>
    %144 = vector.shape_cast %143 : vector<16xf32> to vector<16x1xf32>
    %cst_53 = arith.constant 6.400000e+01 : f32
    %145 = vector.broadcast %cst_53 : f32 to vector<16x1xf32>
    %146 = arith.divf %144, %145 : vector<16x1xf32>
    %147 = vector.broadcast %139 : vector<16x1xf32> to vector<16x64xf32>
    %148 = arith.subf %133, %147 : vector<16x64xf32>
    %cst_54 = arith.constant 9.99999974E-6 : f32
    %149 = vector.broadcast %cst_54 : f32 to vector<16x1xf32>
    %150 = arith.addf %146, %149 : vector<16x1xf32>
    %151 = math.rsqrt %150 : vector<16x1xf32>
    %152 = vector.broadcast %151 : vector<16x1xf32> to vector<16x64xf32>
    %153 = arith.mulf %148, %152 : vector<16x64xf32>
    %154 = vector.broadcast %134 : vector<1x64xf32> to vector<16x64xf32>
    %155 = arith.mulf %153, %154 : vector<16x64xf32>
    %156 = vector.broadcast %135 : vector<1x64xf32> to vector<16x64xf32>
    %157 = arith.addf %155, %156 : vector<16x64xf32>
    %158 = arith.truncf %157 : vector<16x64xf32> to vector<16x64xbf16>
    %c0_55 = arith.constant 0 : index
    %c0_56 = arith.constant 0 : index
    %159 = vector.load %arg10[%c0_55, %c0_56] : memref<64x128xbf16, #tpu.memory_space<vmem>>, vector<64x128xbf16>
    %cst_57 = arith.constant dense<0.000000e+00> : vector<16x128xf32>
    %160 = tpu.matmul %158, %159, %cst_57 {dimension_numbers = #tpu.dot_dimension_numbers<[1], [0], [0], [1], [0, 0, 1, 1], [], []>} : vector<16x64xbf16>, vector<64x128xbf16>, vector<16x128xf32> -> vector<16x128xf32>
    %c0_58 = arith.constant 0 : index
    %c0_59 = arith.constant 0 : index
    %161 = vector.load %arg11[%c0_58, %c0_59] : memref<1x128xf32, #tpu.memory_space<vmem>>, vector<1x128xf32>
    %162 = vector.broadcast %161 : vector<1x128xf32> to vector<16x128xf32>
    %163 = arith.addf %160, %162 : vector<16x128xf32>
    %cst_60 = arith.constant 0.000000e+00 : f32
    %164 = vector.broadcast %cst_60 : f32 to vector<16x128xf32>
    %165 = arith.maximumf %163, %164 : vector<16x128xf32>
    %166 = arith.truncf %165 : vector<16x128xf32> to vector<16x128xbf16>
    %c0_61 = arith.constant 0 : index
    %c0_62 = arith.constant 0 : index
    %167 = vector.load %arg12[%c0_61, %c0_62] : memref<128x64xbf16, #tpu.memory_space<vmem>>, vector<128x64xbf16>
    %cst_63 = arith.constant dense<0.000000e+00> : vector<16x64xf32>
    %168 = tpu.matmul %166, %167, %cst_63 {dimension_numbers = #tpu.dot_dimension_numbers<[1], [0], [0], [1], [0, 0, 1, 1], [], []>} : vector<16x128xbf16>, vector<128x64xbf16>, vector<16x64xf32> -> vector<16x64xf32>
    %c0_64 = arith.constant 0 : index
    %c0_65 = arith.constant 0 : index
    %169 = vector.load %arg13[%c0_64, %c0_65] : memref<1x64xf32, #tpu.memory_space<vmem>>, vector<1x64xf32>
    %170 = vector.broadcast %169 : vector<1x64xf32> to vector<16x64xf32>
    %171 = arith.addf %168, %170 : vector<16x64xf32>
    %172 = arith.addf %133, %171 : vector<16x64xf32>
    %c0_66 = arith.constant 0 : index
    %c0_67 = arith.constant 0 : index
    %173 = vector.load %arg16[%c0_66, %c0_67] : memref<1x64xf32, #tpu.memory_space<vmem>>, vector<1x64xf32>
    %c0_68 = arith.constant 0 : index
    %c0_69 = arith.constant 0 : index
    %174 = vector.load %arg17[%c0_68, %c0_69] : memref<1x64xf32, #tpu.memory_space<vmem>>, vector<1x64xf32>
    %cst_70 = arith.constant dense<0.000000e+00> : vector<16xf32>
    %175 = vector.multi_reduction <add>, %172, %cst_70 [1] : vector<16x64xf32> to vector<16xf32>
    %176 = vector.shape_cast %175 : vector<16xf32> to vector<16x1xf32>
    %cst_71 = arith.constant 6.400000e+01 : f32
    %177 = vector.broadcast %cst_71 : f32 to vector<16x1xf32>
    %178 = arith.divf %176, %177 : vector<16x1xf32>
    %179 = vector.broadcast %178 : vector<16x1xf32> to vector<16x64xf32>
    %180 = arith.subf %172, %179 : vector<16x64xf32>
    %181 = arith.mulf %180, %180 : vector<16x64xf32>
    %cst_72 = arith.constant dense<0.000000e+00> : vector<16xf32>
    %182 = vector.multi_reduction <add>, %181, %cst_72 [1] : vector<16x64xf32> to vector<16xf32>
    %183 = vector.shape_cast %182 : vector<16xf32> to vector<16x1xf32>
    %cst_73 = arith.constant 6.400000e+01 : f32
    %184 = vector.broadcast %cst_73 : f32 to vector<16x1xf32>
    %185 = arith.divf %183, %184 : vector<16x1xf32>
    %186 = vector.broadcast %178 : vector<16x1xf32> to vector<16x64xf32>
    %187 = arith.subf %172, %186 : vector<16x64xf32>
    %cst_74 = arith.constant 9.99999974E-6 : f32
    %188 = vector.broadcast %cst_74 : f32 to vector<16x1xf32>
    %189 = arith.addf %185, %188 : vector<16x1xf32>
    %190 = math.rsqrt %189 : vector<16x1xf32>
    %191 = vector.broadcast %190 : vector<16x1xf32> to vector<16x64xf32>
    %192 = arith.mulf %187, %191 : vector<16x64xf32>
    %193 = vector.broadcast %173 : vector<1x64xf32> to vector<16x64xf32>
    %194 = arith.mulf %192, %193 : vector<16x64xf32>
    %195 = vector.broadcast %174 : vector<1x64xf32> to vector<16x64xf32>
    %196 = arith.addf %194, %195 : vector<16x64xf32>
    %197 = vector.shape_cast %196 : vector<16x64xf32> to vector<2x8x64xf32>
    %c0_75 = arith.constant 0 : index
    %c0_76 = arith.constant 0 : index
    %c0_77 = arith.constant 0 : index
    %198 = vector.load %arg18[%c0_75, %c0_76, %c0_77] : memref<2x8x64xf32, #tpu.memory_space<vmem>>, vector<2x8x64xf32>
    tpu.vector_store %arg18[%c0_75, %c0_76, %c0_77], %197 {strides = array<i32>} : memref<2x8x64xf32, #tpu.memory_space<vmem>>, vector<2x8x64xf32>,
    return
  }
  func.func @transform_0(%arg0: i32) -> (i32, i32, i32) {
    %c0_i32 = arith.constant 0 : i32
    %c0_i32_0 = arith.constant 0 : i32
    %c0_i32_1 = arith.constant 0 : i32
    return %arg0, %c0_i32, %c0_i32_0 : i32, i32, i32
  }
  func.func @transform_1(%arg0: i32) -> (i32, i32, i32) {
    %c0_i32 = arith.constant 0 : i32
    %c0_i32_0 = arith.constant 0 : i32
    %c0_i32_1 = arith.constant 0 : i32
    return %arg0, %c0_i32, %c0_i32_0 : i32, i32, i32
  }
  func.func @transform_2(%arg0: i32) -> (i32, i32, i32) {
    %c0_i32 = arith.constant 0 : i32
    %c0_i32_0 = arith.constant 0 : i32
    %c0_i32_1 = arith.constant 0 : i32
    return %arg0, %c0_i32, %c0_i32_0 : i32, i32, i32
  }
  func.func @transform_3(%arg0: i32) -> (i32, i32) {
    %c0_i32 = arith.constant 0 : i32
    %c0_i32_0 = arith.constant 0 : i32
    %c0_i32_1 = arith.constant 0 : i32
    return %c0_i32, %c0_i32_0 : i32, i32
  }
  func.func @transform_4(%arg0: i32) -> (i32, i32) {
    %c0_i32 = arith.constant 0 : i32
    %c0_i32_0 = arith.constant 0 : i32
    %c0_i32_1 = arith.constant 0 : i32
    return %c0_i32, %c0_i32_0 : i32, i32
  }
  func.func @transform_5(%arg0: i32) -> (i32, i32) {
    %c0_i32 = arith.constant 0 : i32
    %c0_i32_0 = arith.constant 0 : i32
    %c0_i32_1 = arith.constant 0 : i32
    return %c0_i32, %c0_i32_0 : i32, i32
  }
  func.func @transform_6(%arg0: i32) -> (i32, i32) {
    %c0_i32 = arith.constant 0 : i32
    %c0_i32_0 = arith.constant 0 : i32
    %c0_i32_1 = arith.constant 0 : i32
    return %c0_i32, %c0_i32_0 : i32, i32
  }
  func.func @transform_7(%arg0: i32) -> (i32, i32) {
    %c0_i32 = arith.constant 0 : i32
    %c0_i32_0 = arith.constant 0 : i32
    %c0_i32_1 = arith.constant 0 : i32
    return %c0_i32, %c0_i32_0 : i32, i32
  }
  func.func @transform_8(%arg0: i32) -> (i32, i32) {
    %c0_i32 = arith.constant 0 : i32
    %c0_i32_0 = arith.constant 0 : i32
    %c0_i32_1 = arith.constant 0 : i32
    return %c0_i32, %c0_i32_0 : i32, i32
  }
  func.func @transform_9(%arg0: i32) -> (i32, i32) {
    %c0_i32 = arith.constant 0 : i32
    %c0_i32_0 = arith.constant 0 : i32
    %c0_i32_1 = arith.constant 0 : i32
    return %c0_i32, %c0_i32_0 : i32, i32
  }
  func.func @transform_10(%arg0: i32) -> (i32, i32) {
    %c0_i32 = arith.constant 0 : i32
    %c0_i32_0 = arith.constant 0 : i32
    %c0_i32_1 = arith.constant 0 : i32
    return %c0_i32, %c0_i32_0 : i32, i32
  }
  func.func @transform_11(%arg0: i32) -> (i32, i32) {
    %c0_i32 = arith.constant 0 : i32
    %c0_i32_0 = arith.constant 0 : i32
    %c0_i32_1 = arith.constant 0 : i32
    return %c0_i32, %c0_i32_0 : i32, i32
  }
  func.func @transform_12(%arg0: i32) -> (i32, i32) {
    %c0_i32 = arith.constant 0 : i32
    %c0_i32_0 = arith.constant 0 : i32
    %c0_i32_1 = arith.constant 0 : i32
    return %c0_i32, %c0_i32_0 : i32, i32
  }
  func.func @transform_13(%arg0: i32) -> (i32, i32) {
    %c0_i32 = arith.constant 0 : i32
    %c0_i32_0 = arith.constant 0 : i32
    %c0_i32_1 = arith.constant 0 : i32
    return %c0_i32, %c0_i32_0 : i32, i32
  }
  func.func @transform_14(%arg0: i32) -> (i32, i32) {
    %c0_i32 = arith.constant 0 : i32
    %c0_i32_0 = arith.constant 0 : i32
    %c0_i32_1 = arith.constant 0 : i32
    return %c0_i32, %c0_i32_0 : i32, i32
  }
  func.func @transform_15(%arg0: i32) -> (i32, i32) {
    %c0_i32 = arith.constant 0 : i32
    %c0_i32_0 = arith.constant 0 : i32
    %c0_i32_1 = arith.constant 0 : i32
    return %c0_i32, %c0_i32_0 : i32, i32
  }
  func.func @transform_16(%arg0: i32) -> (i32, i32) {
    %c0_i32 = arith.constant 0 : i32
    %c0_i32_0 = arith.constant 0 : i32
    %c0_i32_1 = arith.constant 0 : i32
    return %c0_i32, %c0_i32_0 : i32, i32
  }
  func.func @transform_17(%arg0: i32) -> (i32, i32, i32) {
    %c0_i32 = arith.constant 0 : i32
    %c0_i32_0 = arith.constant 0 : i32
    %c0_i32_1 = arith.constant 0 : i32
    return %arg0, %c0_i32, %c0_i32_0 : i32, i32, i32
  }
}

</mosaic_0001>

<bundles_post_ra>
// kernel: t2v_transformer_encoder_layer.1
= control target key start
LH: loop header
LB: loop body
LE: loop exit
PB: predicated region body
PF: predicated region fallthrough
CT: control target
= control target key end

     0   :  { %s2604_s0 = inlined_call_operand.vmem [shape: f32[2,16,64], index: 0, kind: input, shape index: {}, may-alias: {0,17}]   ;;  %s2605_s1 = inlined_call_operand.vmem [shape: f32[2,16,64], index: 1, kind: input, shape index: {}]   ;;  %s2606_s2 = inlined_call_operand.vmem [shape: f32[2,1,8], index: 2, kind: input, shape index: {}]   ;;  %s2607_s3 = inlined_call_operand.vmem [shape: bf16[64,128], index: 3, kind: input, shape index: {}]   ;;  %s2608_s4 = inlined_call_operand.vmem [shape: f32[1,128], index: 4, kind: input, shape index: {}]   ;;  %s2609_s5 = inlined_call_operand.vmem [shape: bf16[64,64], index: 5, kind: input, shape index: {}]   ;;  %s2610_s6 = inlined_call_operand.vmem [shape: f32[1,64], index: 6, kind: input, shape index: {}]   ;;  %s2611_s7 = inlined_call_operand.vmem [shape: bf16[64,64], index: 7, kind: input, shape index: {}]   ;;  %s2612_s8 = inlined_call_operand.vmem [shape: f32[1,64], index: 8, kind: input, shape index: {}]   ;;  %s2613_s9 = inlined_call_operand.vmem [shape: bf16[64,128], index: 9, kind: input, shape index: {}]   ;;  %s2614_s10 = inlined_call_operand.vmem [shape: f32[1,128], index: 10, kind: input, shape index: {}]   ;;  %s2615_s11 = inlined_call_operand.vmem [shape: bf16[128,64], index: 11, kind: input, shape index: {}]   ;;  %s2616_s12 = inlined_call_operand.vmem [shape: f32[1,64], index: 12, kind: input, shape index: {}]   ;;  %s2617_s13 = inlined_call_operand.vmem [shape: f32[1,64], index: 13, kind: input, shape index: {}]   ;;  %s2618_s14 = inlined_call_operand.vmem [shape: f32[1,64], index: 14, kind: input, shape index: {}]   ;;  %s2619_s15 = inlined_call_operand.vmem [shape: f32[1,64], index: 15, kind: input, shape index: {}]   ;;  %s2620_s16 = inlined_call_operand.vmem [shape: f32[1,64], index: 16, kind: input, shape index: {}]   ;;  %s2621_s17 = inlined_call_operand.vmem [shape: f32[2,16,64], index: 17, kind: output, shape index: {}, may-alias: {0,17}]  }
   0x1   :  { %2624 = sst [smem:[#allocation3_spill]] %s2604_s0 }
   0x2   :  { %2625 = sst [smem:[#allocation4_spill]] %s2605_s1 }
   0x3   :  { %v2040_v0 = vld [vmem:[%s2607_s3 + $0x18] sm:$0xff]   ;;  %v2041_v1 = vld [vmem:[%s2607_s3 + $0x10] sm:$0xff]   ;;  %v2042_v2 = vld [vmem:[%s2607_s3 + $0x8] sm:$0xff]   ;;  %s2626_s18 = sld [smem:[#allocation3_spill]]  ;;  %vm112_vm0 = vcmask 523264   ;;  %v2104_v20 = vmov 0.0  }
   0x4   :  { %1855 = vmatprep.subr.bf16.mxu0 %v2040_v0  ;;  %s2627_s24 = sld [smem:[#allocation4_spill]]  ;;  %v2043_v10 = vld [vmem:[%s2607_s3] sm:$0xff]   ;;  %1867 = vmatprep.subr.bf16.mxu1 %v2104_v20  ;;  %vm2105_vm1 = vmmov 0   ;;  %vm269_vm2 = vcmask 130048   ;;  %v2044_v37 = vld [vmem:[%s2609_s5 + $0x18] sm:$0xff]   ;;  %v2045_v38 = vld [vmem:[%s2609_s5 + $0x10] sm:$0xff]  }
   0x5   :  { %1856 = vmatpush3.bf16.msra.mxu0 %v2040_v0  ;;  %v1731_v19 = vld [vmem:[%s2608_s4] ss:$0 sm:$0xff]  ;;  %1875 = vmatprep.mubr.msk.bf16.mxu1 %vm2105_vm1, %v2104_v20  ;;  %s2106_s4 = smov 64   ;;  %v2046_v39 = vld [vmem:[%s2609_s5 + $0x8] sm:$0xff]   ;;  %vm381_vm3 = vcmask 64512   ;;  %s2107_s19 = smov 48  }
   0x6   :  { %1857 = vmatprep.subr.bf16.mxu0 %v2041_v1  ;;  %1868 = vmatpush3.bf16.msra.mxu1 %v2044_v37  ;;  %v2047_v40 = vld [vmem:[%s2609_s5] sm:$0xff]   ;;  %vm409_vm4 = vcmask 1043456   ;;  %s2109_s20 = smov 32   ;;  %s2110_s3 = smov 96  }
   0x7   :  { %1869 = vmatprep.subr.bf16.mxu1 %v2104_v20  ;;  %v2311_v42 = vld [vmem:[%s2606_s2] ss:$0 sm:$0xff]  ;;  %v2318_v50 = vld [vmem:[%s2606_s2 + $0x1] ss:$0 sm:$0xff]  ;;  %s2111_s23 = smov 16  }
   0x9   :  { %v2215_v3 = vld [vmem:[%s2626_s18] sm:$0xff]  ;;  %v2220_v4 = vld [vmem:[%s2626_s18 + $0x8] sm:$0xff]  ;;  %v2225_v5 = vld [vmem:[%s2626_s18 + $0x18] sm:$0xff]  ;;  %1858 = vmatpush3.bf16.msra.mxu0 %v2041_v1 }
   0xa   :  { %v61_v6 = vld [vmem:[%s2627_s24] sm:$0xff]  ;;  %v62_v7 = vld [vmem:[%s2627_s24 + $0x8] sm:$0xff]  ;;  %v64_v8 = vld [vmem:[%s2627_s24 + $0x18] sm:$0xff]  ;;  %v172_v9 = vpack.c.bf16 %v2225_v5, %v2220_v4  ;;  %1859 = vmatprep.subr.bf16.mxu0 %v2042_v2  ;;  %1870 = vmatpush3.bf16.msra.mxu1 %v2045_v38 }
   0xb   :  { %v67_v11 = vadd.f32 %v61_v6, %v2215_v3  ;;  %v68_v12 = vadd.f32 %v62_v7, %v2220_v4  ;;  %v2246_v13 = vld [vmem:[%s2626_s18 + $0x10] sm:$0xff]  ;;  %v70_v16 = vadd.f32 %v64_v8, %v2225_v5  ;;  %1871 = vmatprep.subr.bf16.mxu1 %v2104_v20  ;;  %v1738_v5 = vld [vmem:[%s2610_s6] ss:$0 sm:$0xff]  ;;  %s2108_s6 = smov 112  }
   0xc   :  { %v63_v14 = vld [vmem:[%s2627_s24 + $0x10] sm:$0xff]  ;;  %s2112_s24 = smov 80  }
   0xd   :  { %v71_v15 = vpack.c.bf16 %v68_v12, %v67_v11  ;;  %v69_v17 = vadd.f32 %v63_v14, %v2246_v13  ;;  %1860 = vmatpush3.bf16.msra.mxu0 %v2042_v2 }
   0xe   :  { %1861 = vmatprep.subr.bf16.mxu0 %v2043_v10  ;;  %1872 = vmatpush3.bf16.msra.mxu1 %v2046_v39 }
   0xf   :  { %1863 = vmatprep.mubr.msk.bf16.mxu0 %vm112_vm0, %v71_v15  ;;  %v72_v18 = vpack.c.bf16 %v70_v16, %v69_v17  ;;  %1873 = vmatprep.subr.bf16.mxu1 %v2104_v20 }
  0x11   :  { %1862 = vmatpush3.bf16.msra.mxu0 %v2043_v10 }
  0x12   :  { %1879 = vmatprep.subr.bf16.mxu0 %v2104_v20  ;;  %1874 = vmatpush3.bf16.msra.mxu1 %v2047_v40 }
  0x13   :  { %1897 = vmatprep.subr.bf16.mxu1 %v2104_v20 }
  0x14   :  { %1864 = vmatmul.mubr.msk.bf16.vlgmr.msra.gmra.mxu0 %vm112_vm0, %v72_v18 }
  0x15   :  { %1881 = vmatprep.mubr.msk.bf16.mxu0 %vm2105_vm1, %v2104_v20  ;;  %1876 = vmatmul.mubr.msk.bf16.vlgmr.msra.gmra.mxu1 %vm112_vm0, %v172_v9 }
  0x16   :  { %1899 = vmatprep.mubr.msk.bf16.mxu1 %vm2105_vm1, %v2104_v20 }
  0xd4   :  { %v1865_v21 = vpop.f32.mrf.mxu0 }
  0xd5   :  { %v162_v22 = vadd.f32 %v1865_v21, %v1731_v19  ;;  %v249_v4 = vpop.f32.mrf.mxu1 }
  0xd6   :  { %v153_v23 = vpop.f32.mrf.mxu0  ;;  %v250_v7 = vadd.f32 %v1738_v5, %v249_v4 }
  0xd7   :  { %v154_v24 = vadd.f32 %v1731_v19, %v153_v23  ;;  %v2280_v36 = vpack.c.bf16 %v162_v22, %v162_v22  ;;  %v1877_v6 = vpop.f32.mrf.mxu1 }
  0xd8   :  { %v1866_v25 = vpop.f32.mrf.mxu0  ;;  %v2329_v11 = vpack.c.bf16 %v250_v7, %v250_v7 }
  0xd9   :  { %v165_v28 = vadd.f32 %v1866_v25, %v1731_v19  ;;  %v2272_v34 = vpack.c.bf16 %v154_v24, %v154_v24  ;;  %v252_v8 = vpop.f32.mrf.mxu1 }
  0xda   :  { %v156_v26 = vpop.f32.mrf.mxu0  ;;  %v253_v9 = vadd.f32 %v1738_v5, %v252_v8  ;;  %v411_v14 = vsel %vm409_vm4, %v2329_v11, 0 }
  0xdb   :  { %v157_v27 = vadd.f32 %v1731_v19, %v156_v26  ;;  %v2267_v30 = vpack.c.bf16 %v165_v28, %v165_v28  ;;  %v1878_v10 = vpop.f32.mrf.mxu1 }
  0xdc   :  { %v2331_v12 = vpack.c.bf16 %v253_v9, %v253_v9 }
  0xdd   :  { %v2264_v29 = vpack.c.bf16 %v157_v27, %v157_v27 }
  0xde   :  { %v457_v15 = vsel %vm409_vm4, %v2331_v12, 0 }
  0xdf   :  { %267 = vrot.lane.b32.xlu0 %v2264_v29, %s2106_s4  ;;  %1898 = vmatpush3.bf16.msra.mxu1 %v457_v15 }
  0xe0   :  { %1909 = vmatprep.subr.bf16.mxu1 %v2104_v20 }
  0xe3   :  { %317 = vrot.lane.b32.xlu0 %v2267_v30, %s2106_s4 }
 0x151   :  { %v268_v31 = vpop.permute.xlu0 %267 }
 0x152   :  { %v274_v32 = vsel %vm269_vm2, %v268_v31, 0 }
 0x153   :  { %1880 = vmatpush3.bf16.xpose.msra.mxu0 %v274_v32 }
 0x154   :  { %1885 = vmatprep.subr.bf16.mxu0 %v2104_v20 }
 0x155   :  { %v318_v33 = vpop.permute.xlu0 %317 }
 0x156   :  { %v323_v35 = vsel %vm269_vm2, %v318_v33, 0 }
 0x15a   :  { %1882 = vmatmul.mubr.msk.bf16.vlgmr.msra.gmra.mxu0 %vm269_vm2, %v2272_v34 }
 0x15b   :  { %1886 = vmatpush3.bf16.xpose.msra.mxu0 %v323_v35  ;;  %1887 = vmatprep.mubr.msk.bf16.mxu0 %vm2105_vm1, %v2104_v20 }
 0x15c   :  { %1891 = vmatprep.subr.bf16.mxu0 %v2104_v20 }
 0x162   :  { %1888 = vmatmul.mubr.msk.bf16.vlgmr.msra.gmra.mxu0 %vm269_vm2, %v2280_v36 }
 0x163   :  { %1893 = vmatprep.mubr.msk.bf16.mxu0 %vm2105_vm1, %v2104_v20  ;;  %1892 = vmatpush3.bf16.msra.mxu0 %v411_v14 }
 0x164   :  { %1903 = vmatprep.subr.bf16.mxu0 %v2104_v20 }
 0x21a   :  { %v310_v41 = vpop.f32.mrf.mxu0 }
 0x21b   :  { %v365_v43 = vmul.f32 0.25, %v310_v41 }
 0x21c   :  { %v1883_v44 = vpop.f32.mrf.mxu0 }
 0x21d   :  { %v379_v45 = vadd.f32 %v2311_v42, %v365_v43 }
 0x21e   :  { %v313_v46 = vpop.f32.mrf.mxu0 }
 0x21f   :  { %v382_v47 = vsel %vm381_vm3, %v379_v45, -inf }
 0x220   :  { %383 = vmax.xlane.f32.xlu1 %v382_v47  ;;  %v1884_v48 = vpop.f32.mrf.mxu0 }
 0x222   :  { %v359_v49 = vpop.f32.mrf.mxu0 }
 0x223   :  { %v366_v51 = vmul.f32 0.25, %v359_v49 }
 0x224   :  { %v1889_v52 = vpop.f32.mrf.mxu0 }
 0x225   :  { %v380_v53 = vadd.f32 %v2318_v50, %v366_v51 }
 0x226   :  { %v362_v54 = vpop.f32.mrf.mxu0 }
 0x227   :  { %v385_v55 = vsel %vm381_vm3, %v380_v53, -inf }
 0x228   :  { %386 = vmax.xlane.f32.xlu1 %v385_v55  ;;  %v1890_v56 = vpop.f32.mrf.mxu0 }
 0x239   :  { %503 = vrot.lane.b32.xlu1 %v2264_v29, %s2107_s19 }
 0x23d   :  { %554 = vrot.lane.b32.xlu1 %v2267_v30, %s2107_s19 }
 0x2a9   :  { %v384_v57 = vpop.xlane.xlu1 %383 }
 0x2aa   :  { %v388_v58 = vsub.f32 %v379_v45, %v384_v57 }
 0x2ac   :  { %v390_v59 = vmul.f32 1.442695, %v388_v58 }
 0x2ae   :  { %2064 = vpow2.f32 %v390_v59 }
 0x2b1   :  { %v387_v60 = vpop.xlane.xlu1 %386 }
 0x2b2   :  { %v389_v61 = vsub.f32 %v380_v53, %v387_v60 }
 0x2b4   :  { %v392_v62 = vmul.f32 1.442695, %v389_v61 }
 0x2b5   :  { %v504_v16 = vpop.permute.xlu1 %503 }
 0x2b6   :  { %2066 = vpow2.f32 %v392_v62  ;;  %v509_v24 = vsel %vm269_vm2, %v504_v16, 0 }
 0x2b9   :  { %v555_v18 = vpop.permute.xlu1 %554 }
 0x2ba   :  { %v560_v31 = vsel %vm269_vm2, %v555_v18, 0 }
 0x2bb   :  { %v2065_v63 = vpop.eup %2064 }
 0x2bc   :  { %v394_v0 = vsel %vm381_vm3, %v2065_v63, 0.0 }
 0x2bd   :  { %395 = vadd.xlane.f32.xlu0 %v394_v0 }
 0x2c3   :  { %v2067_v1 = vpop.eup %2066 }
 0x2c4   :  { %v397_v2 = vsel %vm381_vm3, %v2067_v1, 0.0 }
 0x2c5   :  { %398 = vadd.xlane.f32.xlu1 %v397_v2 }
 0x2d6   :  { %501 = vrot.lane.b32.xlu1 %v2272_v34, %s2108_s6 }
 0x2da   :  { %552 = vrot.lane.b32.xlu1 %v2280_v36, %s2108_s6 }
 0x346   :  { %v396_v17 = vpop.xlane.xlu0 %395 }
 0x347   :  { %2068 = vrcp.f32 %v396_v17 }
 0x34e   :  { %v399_v19 = vpop.xlane.xlu1 %398 }
 0x34f   :  { %2070 = vrcp.f32 %v399_v19 }
 0x352   :  { %v502_v28 = vpop.permute.xlu1 %501 }
 0x354   :  { %v2069_v21 = vpop.eup %2068 }
 0x355   :  { %v402_v22 = vmul.f32 %v2069_v21, %v2065_v63 }
 0x356   :  { %v553_v32 = vpop.permute.xlu1 %552 }
 0x357   :  { %v404_v23 = vpack.c.bf16 %v402_v22, %v402_v22  ;;  %v2048_v22 = vld [vmem:[%s2611_s7] sm:$0xff]  }
 0x359   :  { %1894 = vmatmul.mubr.msk.bf16.vlgmr.msra.gmra.mxu0 %vm381_vm3, %v404_v23 }
 0x35a   :  { %1904 = vmatpush3.bf16.xpose.msra.mxu0 %v509_v24  ;;  %1905 = vmatprep.mubr.msk.bf16.mxu0 %vm2105_vm1, %v2104_v20 }
 0x35b   :  { %1915 = vmatprep.subr.bf16.mxu0 %v2104_v20 }
 0x35c   :  { %v2071_v25 = vpop.eup %2070 }
 0x35d   :  { %v403_v26 = vmul.f32 %v2071_v25, %v2067_v1 }
 0x35f   :  { %v405_v27 = vpack.c.bf16 %v403_v26, %v403_v26 }
 0x361   :  { %1900 = vmatmul.mubr.msk.bf16.vlgmr.msra.gmra.mxu1 %vm381_vm3, %v405_v27  ;;  %1906 = vmatmul.mubr.msk.bf16.vlgmr.msra.gmra.mxu0 %vm269_vm2, %v502_v28 }
 0x362   :  { %1910 = vmatpush3.bf16.xpose.msra.mxu1 %v560_v31  ;;  %1911 = vmatprep.mubr.msk.bf16.mxu1 %vm2105_vm1, %v2104_v20  ;;  %v2049_v31 = vld [vmem:[%s2611_s7 + $0x8] sm:$0xff]  }
 0x363   :  { %1921 = vmatprep.subr.bf16.mxu1 %v2104_v20  ;;  %1917 = vmatprep.mubr.msk.bf16.mxu0 %vm2105_vm1, %v2104_v20 }
 0x369   :  { %1912 = vmatmul.mubr.msk.bf16.vlgmr.msra.gmra.mxu1 %vm269_vm2, %v553_v32 }
 0x36a   :  { %1923 = vmatprep.mubr.msk.bf16.mxu1 %vm2105_vm1, %v2104_v20 }
 0x419   :  { %v2359_v33 = vpop.f32.mrf.mxu0 }
 0x41b   :  { %v1895_v35 = vpop.f32.mrf.mxu0 }
 0x41d   :  { %v450_v37 = vpop.f32.mrf.mxu0 }
 0x41f   :  { %v1896_v38 = vpop.f32.mrf.mxu0 }
 0x421   :  { %v2361_v39 = vpop.f32.mrf.mxu1  ;;  %v545_v40 = vpop.f32.mrf.mxu0 }
 0x422   :  { %v499_v41 = vpack.c.bf16 %v2361_v39, %v2359_v33  ;;  %v602_v43 = vmul.f32 0.25, %v545_v40 }
 0x423   :  { %v1901_v44 = vpop.f32.mrf.mxu1  ;;  %v1907_v45 = vpop.f32.mrf.mxu0 }
 0x424   :  { %v604_v46 = vadd.f32 %v2311_v42, %v602_v43 }
 0x425   :  { %v496_v47 = vpop.f32.mrf.mxu1  ;;  %v548_v48 = vpop.f32.mrf.mxu0 }
 0x426   :  { %v606_v49 = vsel %vm381_vm3, %v604_v46, -inf }
 0x427   :  { %v1902_v51 = vpop.f32.mrf.mxu1  ;;  %607 = vmax.xlane.f32.xlu0 %v606_v49  ;;  %v1908_v52 = vpop.f32.mrf.mxu0 }
 0x429   :  { %v596_v53 = vpop.f32.mrf.mxu1 }
 0x42a   :  { %v603_v54 = vmul.f32 0.25, %v596_v53 }
 0x42b   :  { %v1913_v55 = vpop.f32.mrf.mxu1 }
 0x42c   :  { %v605_v56 = vadd.f32 %v2318_v50, %v603_v54 }
 0x42d   :  { %v599_v57 = vpop.f32.mrf.mxu1 }
 0x42e   :  { %v609_v58 = vsel %vm381_vm3, %v605_v56, -inf }
 0x42f   :  { %610 = vmax.xlane.f32.xlu1 %v609_v58  ;;  %v1914_v59 = vpop.f32.mrf.mxu1 }
 0x43d   :  { %631 = vrot.lane.b32.xlu0 %v2329_v11, %s2108_s6 }
 0x440   :  { %881 = vrot.lane.b32.xlu1 %v2267_v30, %s2109_s20 }
 0x4b0   :  { %v608_v60 = vpop.xlane.xlu0 %607 }
 0x4b1   :  { %v612_v61 = vsub.f32 %v604_v46, %v608_v60 }
 0x4b3   :  { %v614_v62 = vmul.f32 1.442695, %v612_v61 }
 0x4b4   :  { %v632_v63 = vpop.permute.xlu0 %631 }
 0x4b5   :  { %2072 = vpow2.f32 %v614_v62  ;;  %v637_v0 = vsel %vm409_vm4, %v632_v63, 0 }
 0x4b6   :  { %1916 = vmatpush3.bf16.msra.mxu0 %v637_v0 }
 0x4b7   :  { %1927 = vmatprep.subr.bf16.mxu0 %v2104_v20 }
 0x4b8   :  { %v611_v1 = vpop.xlane.xlu1 %610 }
 0x4b9   :  { %v613_v2 = vsub.f32 %v605_v56, %v611_v1 }
 0x4bb   :  { %v616_v4 = vmul.f32 1.442695, %v613_v2 }
 0x4bc   :  { %v882_v25 = vpop.permute.xlu1 %881 }
 0x4bd   :  { %2074 = vpow2.f32 %v616_v4  ;;  %v887_v26 = vsel %vm269_vm2, %v882_v25, 0 }
 0x4c2   :  { %v2073_v5 = vpop.eup %2072 }
 0x4c3   :  { %v618_v6 = vsel %vm381_vm3, %v2073_v5, 0.0 }
 0x4c4   :  { %619 = vadd.xlane.f32.xlu0 %v618_v6 }
 0x4ca   :  { %v2075_v7 = vpop.eup %2074 }
 0x4cb   :  { %v621_v8 = vsel %vm381_vm3, %v2075_v7, 0.0 }
 0x4cc   :  { %622 = vadd.xlane.f32.xlu0 %v621_v8 }
 0x4e2   :  { %680 = vrot.lane.b32.xlu0 %v2331_v12, %s2108_s6 }
 0x4e6   :  { %831 = vrot.lane.b32.xlu0 %v2264_v29, %s2109_s20 }
 0x4ea   :  { %829 = vrot.lane.b32.xlu0 %v2272_v34, %s2110_s3 }
 0x4ee   :  { %879 = vrot.lane.b32.xlu0 %v2280_v36, %s2110_s3 }
 0x54d   :  { %v620_v9 = vpop.xlane.xlu0 %619 }
 0x54e   :  { %2076 = vrcp.f32 %v620_v9 }
 0x555   :  { %v623_v10 = vpop.xlane.xlu0 %622 }
 0x556   :  { %2078 = vrcp.f32 %v623_v10 }
 0x559   :  { %v681_v14 = vpop.permute.xlu0 %680 }
 0x55a   :  { %v686_v15 = vsel %vm409_vm4, %v681_v14, 0 }
 0x55b   :  { %v2077_v16 = vpop.eup %2076  ;;  %1922 = vmatpush3.bf16.msra.mxu1 %v686_v15 }
 0x55c   :  { %v626_v17 = vmul.f32 %v2077_v16, %v2073_v5  ;;  %1933 = vmatprep.subr.bf16.mxu1 %v2104_v20 }
 0x55d   :  { %v832_v24 = vpop.permute.xlu0 %831 }
 0x55e   :  { %v628_v18 = vpack.c.bf16 %v626_v17, %v626_v17 }
 0x560   :  { %1918 = vmatmul.mubr.msk.bf16.vlgmr.msra.gmra.mxu0 %vm381_vm3, %v628_v18 }
 0x561   :  { %1929 = vmatprep.mubr.msk.bf16.mxu0 %vm2105_vm1, %v2104_v20  ;;  %v830_v27 = vpop.permute.xlu0 %829  ;;  %1928 = vmatpush3.bf16.msra.mxu0 %v2049_v31 }
 0x562   :  { %1939 = vmatprep.subr.bf16.mxu0 %v2104_v20 }
 0x563   :  { %v2079_v19 = vpop.eup %2078 }
 0x564   :  { %v627_v21 = vmul.f32 %v2079_v19, %v2075_v7 }
 0x565   :  { %v880_v28 = vpop.permute.xlu0 %879 }
 0x566   :  { %v629_v23 = vpack.c.bf16 %v627_v21, %v627_v21 }
 0x568   :  { %1924 = vmatmul.mubr.msk.bf16.vlgmr.msra.gmra.mxu1 %vm381_vm3, %v629_v23 }
 0x569   :  { %1934 = vmatpush3.bf16.msra.mxu1 %v2048_v22  ;;  %1935 = vmatprep.mubr.msk.bf16.mxu1 %vm2105_vm1, %v2104_v20 }
 0x56a   :  { %1945 = vmatprep.subr.bf16.mxu1 %v2104_v20 }
 0x570   :  { %1936 = vmatmul.mubr.msk.bf16.vlgmr.msra.gmra.mxu1 %vm269_vm2, %v499_v41  ;;  %v837_v41 = vsel %vm269_vm2, %v832_v24, 0 }
 0x571   :  { %1946 = vmatpush3.bf16.xpose.msra.mxu1 %v887_v26  ;;  %1947 = vmatprep.mubr.msk.bf16.mxu1 %vm2105_vm1, %v2104_v20 }
 0x572   :  { %1957 = vmatprep.subr.bf16.mxu1 %v2104_v20 }
 0x578   :  { %1948 = vmatmul.mubr.msk.bf16.vlgmr.msra.gmra.mxu1 %vm269_vm2, %v880_v28 }
 0x579   :  { %1959 = vmatprep.mubr.msk.bf16.mxu1 %vm2105_vm1, %v2104_v20 }
 0x620   :  { %v673_v32 = vpop.f32.mrf.mxu0 }
 0x622   :  { %v1919_v33 = vpop.f32.mrf.mxu0 }
 0x623   :  { %v2050_v33 = vld [vmem:[%s2611_s7 + $0x10] sm:$0xff]  }
 0x624   :  { %v676_v35 = vpop.f32.mrf.mxu0 }
 0x626   :  { %v1920_v37 = vpop.f32.mrf.mxu0 }
 0x628   :  { %v722_v38 = vpop.f32.mrf.mxu1 }
 0x629   :  { %v728_v39 = vpack.c.bf16 %v722_v38, %v673_v32 }
 0x62a   :  { %v1925_v40 = vpop.f32.mrf.mxu1 }
 0x62b   :  { %1930 = vmatmul.mubr.msk.bf16.vlgmr.msra.gmra.mxu0 %vm269_vm2, %v728_v39 }
 0x62c   :  { %1940 = vmatpush3.bf16.xpose.msra.mxu0 %v837_v41  ;;  %v725_v43 = vpop.f32.mrf.mxu1  ;;  %1941 = vmatprep.mubr.msk.bf16.mxu0 %vm2105_vm1, %v2104_v20 }
 0x62d   :  { %1951 = vmatprep.subr.bf16.mxu0 %v2104_v20 }
 0x62e   :  { %v1926_v44 = vpop.f32.mrf.mxu1 }
 0x630   :  { %v2415_v45 = vpop.f32.mrf.mxu1 }
 0x632   :  { %v1937_v46 = vpop.f32.mrf.mxu1 }
 0x633   :  { %1942 = vmatmul.mubr.msk.bf16.vlgmr.msra.gmra.mxu0 %vm269_vm2, %v830_v27 }
 0x634   :  { %v2418_v47 = vpop.f32.mrf.mxu1  ;;  %1953 = vmatprep.mubr.msk.bf16.mxu0 %vm2105_vm1, %v2104_v20 }
 0x636   :  { %v1938_v48 = vpop.f32.mrf.mxu1 }
 0x638   :  { %v923_v49 = vpop.f32.mrf.mxu1 }
 0x639   :  { %v930_v51 = vmul.f32 0.25, %v923_v49 }
 0x63a   :  { %v1949_v52 = vpop.f32.mrf.mxu1 }
 0x63b   :  { %v932_v53 = vadd.f32 %v2318_v50, %v930_v51 }
 0x63c   :  { %v926_v54 = vpop.f32.mrf.mxu1 }
 0x63d   :  { %v936_v55 = vsel %vm381_vm3, %v932_v53, -inf }
 0x63e   :  { %937 = vmax.xlane.f32.xlu1 %v936_v55  ;;  %v1950_v56 = vpop.f32.mrf.mxu1 }
 0x64f   :  { %1005 = vrot.lane.b32.xlu1 %v2331_v12, %s2110_s3 }
 0x653   :  { %1108 = vrot.lane.b32.xlu1 %v2264_v29, %s2111_s23 }
 0x657   :  { %1106 = vrot.lane.b32.xlu1 %v2272_v34, %s2112_s24 }
 0x6c7   :  { %v938_v57 = vpop.xlane.xlu1 %937 }
 0x6c8   :  { %v940_v60 = vsub.f32 %v932_v53, %v938_v57 }
 0x6ca   :  { %v943_v61 = vmul.f32 1.442695, %v940_v60 }
 0x6cb   :  { %v1006_v58 = vpop.permute.xlu1 %1005 }
 0x6cc   :  { %v1011_v59 = vsel %vm409_vm4, %v1006_v58, 0  ;;  %2080 = vpow2.f32 %v943_v61 }
 0x6cd   :  { %1958 = vmatpush3.bf16.msra.mxu1 %v1011_v59 }
 0x6ce   :  { %1969 = vmatprep.subr.bf16.mxu1 %v2104_v20 }
 0x6cf   :  { %v1109_v22 = vpop.permute.xlu1 %1108 }
 0x6d0   :  { %v1114_v24 = vsel %vm269_vm2, %v1109_v22, 0 }
 0x6d3   :  { %v1107_v25 = vpop.permute.xlu1 %1106 }
 0x6d9   :  { %v2081_v7 = vpop.eup %2080 }
 0x6da   :  { %v948_v9 = vsel %vm381_vm3, %v2081_v7, 0.0 }
 0x6eb   :  { %v2432_v62 = vpop.f32.mrf.mxu0 }
 0x6ec   :  { %v823_v60 = vadd.f32 %v2415_v45, %v2432_v62 }
 0x6ed   :  { %v1931_v63 = vpop.f32.mrf.mxu0 }
 0x6ef   :  { %v2434_v0 = vpop.f32.mrf.mxu0 }
 0x6f1   :  { %v1932_v29 = vpop.f32.mrf.mxu0 }
 0x6f3   :  { %v873_v1 = vpop.f32.mrf.mxu0 }
 0x6f4   :  { %v929_v2 = vmul.f32 0.25, %v873_v1  ;;  %v826_v1 = vadd.f32 %v2418_v47, %v2434_v0 }
 0x6f5   :  { %v1943_v4 = vpop.f32.mrf.mxu0 }
 0x6f6   :  { %v931_v34 = vadd.f32 %v2311_v42, %v929_v2 }
 0x6f7   :  { %v876_v5 = vpop.f32.mrf.mxu0 }
 0x6f8   :  { %v933_v6 = vsel %vm381_vm3, %v931_v34, -inf }
 0x6f9   :  { %934 = vmax.xlane.f32.xlu0 %v933_v6  ;;  %v1944_v8 = vpop.f32.mrf.mxu0 }
 0x6fd   :  { %949 = vadd.xlane.f32.xlu0 %v948_v9 }
 0x782   :  { %v935_v10 = vpop.xlane.xlu0 %934 }
 0x783   :  { %v939_v14 = vsub.f32 %v931_v34, %v935_v10 }
 0x785   :  { %v941_v15 = vmul.f32 1.442695, %v939_v14 }
 0x786   :  { %v950_v16 = vpop.xlane.xlu0 %949 }
 0x787   :  { %2082 = vpow2.f32 %v941_v15 }
 0x788   :  { %2084 = vrcp.f32 %v950_v16 }
 0x794   :  { %v2083_v17 = vpop.eup %2082 }
 0x795   :  { %v2085_v18 = vpop.eup %2084  ;;  %v945_v19 = vsel %vm381_vm3, %v2083_v17, 0.0 }
 0x796   :  { %946 = vadd.xlane.f32.xlu0 %v945_v19  ;;  %v954_v21 = vmul.f32 %v2085_v18, %v2081_v7 }
 0x798   :  { %v956_v23 = vpack.c.bf16 %v954_v21, %v954_v21 }
 0x79a   :  { %1960 = vmatmul.mubr.msk.bf16.vlgmr.msra.gmra.mxu1 %vm381_vm3, %v956_v23 }
 0x79b   :  { %1970 = vmatpush3.bf16.xpose.msra.mxu1 %v1114_v24  ;;  %1971 = vmatprep.mubr.msk.bf16.mxu1 %vm2105_vm1, %v2104_v20 }
 0x79c   :  { %1981 = vmatprep.subr.bf16.mxu1 %v2104_v20 }
 0x7a2   :  { %1972 = vmatmul.mubr.msk.bf16.vlgmr.msra.gmra.mxu1 %vm269_vm2, %v1107_v25 }
 0x7a3   :  { %1983 = vmatprep.mubr.msk.bf16.mxu1 %vm2105_vm1, %v2104_v20 }
 0x7ac   :  { %957 = vrot.lane.b32.xlu0 %v2329_v11, %s2110_s3 }
 0x7b0   :  { %1158 = vrot.lane.b32.xlu0 %v2267_v30, %s2111_s23 }
 0x7b4   :  { %1156 = vrot.lane.b32.xlu0 %v2280_v36, %s2112_s24 }
 0x81f   :  { %v947_v26 = vpop.xlane.xlu0 %946 }
 0x820   :  { %2086 = vrcp.f32 %v947_v26 }
 0x823   :  { %v958_v27 = vpop.permute.xlu0 %957 }
 0x824   :  { %v963_v28 = vsel %vm409_vm4, %v958_v27, 0 }
 0x825   :  { %1952 = vmatpush3.bf16.msra.mxu0 %v963_v28 }
 0x826   :  { %1963 = vmatprep.subr.bf16.mxu0 %v2104_v20 }
 0x827   :  { %v1159_v49 = vpop.permute.xlu0 %1158 }
 0x828   :  { %v1164_v54 = vsel %vm269_vm2, %v1159_v49, 0 }
 0x82b   :  { %v1157_v56 = vpop.permute.xlu0 %1156 }
 0x82d   :  { %v2087_v31 = vpop.eup %2086 }
 0x82e   :  { %v953_v32 = vmul.f32 %v2087_v31, %v2083_v17 }
 0x830   :  { %v955_v35 = vpack.c.bf16 %v953_v32, %v953_v32 }
 0x832   :  { %1954 = vmatmul.mubr.msk.bf16.vlgmr.msra.gmra.mxu0 %vm381_vm3, %v955_v35 }
 0x833   :  { %1964 = vmatpush3.bf16.msra.mxu0 %v2050_v33  ;;  %1965 = vmatprep.mubr.msk.bf16.mxu0 %vm2105_vm1, %v2104_v20 }
 0x834   :  { %1975 = vmatprep.subr.bf16.mxu0 %v2104_v20 }
 0x85a   :  { %v1047_v30 = vpop.f32.mrf.mxu1 }
 0x85c   :  { %v1961_v36 = vpop.f32.mrf.mxu1 }
 0x85e   :  { %v1050_v37 = vpop.f32.mrf.mxu1 }
 0x860   :  { %v1962_v38 = vpop.f32.mrf.mxu1 }
 0x862   :  { %v1150_v39 = vpop.f32.mrf.mxu1 }
 0x863   :  { %v1206_v40 = vmul.f32 0.25, %v1150_v39 }
 0x864   :  { %v1973_v41 = vpop.f32.mrf.mxu1 }
 0x865   :  { %v1208_v43 = vadd.f32 %v2311_v42, %v1206_v40  ;;  %v1770_v41 = vld [vmem:[%s2612_s8] ss:$0 sm:$0xff] }
 0x866   :  { %v1153_v44 = vpop.f32.mrf.mxu1 }
 0x867   :  { %v1210_v46 = vsel %vm381_vm3, %v1208_v43, -inf }
 0x868   :  { %1211 = vmax.xlane.f32.xlu1 %v1210_v46  ;;  %v1974_v48 = vpop.f32.mrf.mxu1 }
 0x8f1   :  { %v1212_v57 = vpop.xlane.xlu1 %1211 }
 0x8f2   :  { %v999_v51 = vpop.f32.mrf.mxu0  ;;  %v1216_v58 = vsub.f32 %v1208_v43, %v1212_v57 }
 0x8f3   :  { %v1053_v52 = vpack.c.bf16 %v1047_v30, %v999_v51 }
 0x8f4   :  { %v1955_v53 = vpop.f32.mrf.mxu0  ;;  %v1218_v59 = vmul.f32 1.442695, %v1216_v58 }
 0x8f5   :  { %1966 = vmatmul.mubr.msk.bf16.vlgmr.msra.gmra.mxu0 %vm269_vm2, %v1053_v52 }
 0x8f6   :  { %1976 = vmatpush3.bf16.xpose.msra.mxu0 %v1164_v54  ;;  %v1002_v55 = vpop.f32.mrf.mxu0  ;;  %1977 = vmatprep.mubr.msk.bf16.mxu0 %vm2105_vm1, %v2104_v20  ;;  %2088 = vpow2.f32 %v1218_v59 }
 0x8f7   :  { %1987 = vmatprep.subr.bf16.mxu0 %v2104_v20 }
 0x8f8   :  { %v1956_v42 = vpop.f32.mrf.mxu0 }
 0x8fd   :  { %1978 = vmatmul.mubr.msk.bf16.vlgmr.msra.gmra.mxu0 %vm269_vm2, %v1157_v56 }
 0x8fe   :  { %1989 = vmatprep.mubr.msk.bf16.mxu0 %vm2105_vm1, %v2104_v20 }
 0x903   :  { %v2089_v62 = vpop.eup %2088 }
 0x904   :  { %v1222_v14 = vsel %vm381_vm3, %v2089_v62, 0.0 }
 0x9b5   :  { %v1097_v61 = vpop.f32.mrf.mxu0 }
 0x9b6   :  { %v2475_v63 = vadd.f32 %v1097_v61, %v823_v60 }
 0x9b7   :  { %v1967_v29 = vpop.f32.mrf.mxu0 }
 0x9b9   :  { %v1100_v2 = vpop.f32.mrf.mxu0 }
 0x9ba   :  { %v2479_v4 = vadd.f32 %v1100_v2, %v826_v1  ;;  %v2052_v1 = vld [vmem:[%s2613_s9 + $0x18] sm:$0xff]   ;;  %v2053_v2 = vld [vmem:[%s2613_s9 + $0x10] sm:$0xff]  }
 0x9bb   :  { %v1968_v34 = vpop.f32.mrf.mxu0 }
 0x9bc   :  { %v2055_v34 = vld [vmem:[%s2613_s9] sm:$0xff]  }
 0x9bd   :  { %v1200_v5 = vpop.f32.mrf.mxu0 }
 0x9be   :  { %v1207_v6 = vmul.f32 0.25, %v1200_v5  ;;  %v2056_v5 = vld [vmem:[%s2615_s11 + $0x38] sm:$0xff]  }
 0x9bf   :  { %v1979_v7 = vpop.f32.mrf.mxu0 }
 0x9c0   :  { %v1209_v8 = vadd.f32 %v2318_v50, %v1207_v6  ;;  %v2057_v6 = vld [vmem:[%s2615_s11 + $0x30] sm:$0xff]   ;;  %v2058_v7 = vld [vmem:[%s2615_s11 + $0x28] sm:$0xff]  }
 0x9c1   :  { %v1203_v9 = vpop.f32.mrf.mxu0 }
 0x9c2   :  { %v1213_v45 = vsel %vm381_vm3, %v1209_v8, -inf  ;;  %v2060_v9 = vld [vmem:[%s2615_s11 + $0x18] sm:$0xff]  }
 0x9c3   :  { %1214 = vmax.xlane.f32.xlu0 %v1213_v45  ;;  %v1980_v10 = vpop.f32.mrf.mxu0 }
 0x9c7   :  { %1223 = vadd.xlane.f32.xlu0 %v1222_v14 }
 0x9dd   :  { %1234 = vrot.lane.b32.xlu0 %v2329_v11, %s2112_s24  ;;  %v2051_v11 = vld [vmem:[%s2611_s7 + $0x18] sm:$0xff]  }
 0xa4c   :  { %v1215_v47 = vpop.xlane.xlu0 %1214 }
 0xa4d   :  { %v1217_v0 = vsub.f32 %v1209_v8, %v1215_v47  ;;  %v2059_v8 = vld [vmem:[%s2615_s11 + $0x20] sm:$0xff]  }
 0xa4f   :  { %v1220_v15 = vmul.f32 1.442695, %v1217_v0 }
 0xa50   :  { %v1224_v16 = vpop.xlane.xlu0 %1223 }
 0xa51   :  { %2090 = vpow2.f32 %v1220_v15 }
 0xa52   :  { %2092 = vrcp.f32 %v1224_v16 }
 0xa54   :  { %v1235_v17 = vpop.permute.xlu0 %1234 }
 0xa55   :  { %v1240_v50 = vsel %vm409_vm4, %v1235_v17, 0  ;;  %v1771_v17 = vld [vmem:[%s2617_s13] ss:$0 sm:$0xff] }
 0xa56   :  { %1982 = vmatpush3.bf16.msra.mxu1 %v1240_v50 }
 0xa57   :  { %1993 = vmatprep.subr.bf16.mxu1 %v2104_v20 }
 0xa5e   :  { %v2091_v18 = vpop.eup %2090 }
 0xa5f   :  { %v2093_v19 = vpop.eup %2092  ;;  %v1225_v21 = vsel %vm381_vm3, %v2091_v18, 0.0 }
 0xa60   :  { %1226 = vadd.xlane.f32.xlu1 %v1225_v21  ;;  %v1230_v22 = vmul.f32 %v2093_v19, %v2089_v62  ;;  %v1772_v21 = vld [vmem:[%s2618_s14] ss:$0 sm:$0xff] }
 0xa62   :  { %v1232_v23 = vpack.c.bf16 %v1230_v22, %v1230_v22 }
 0xa64   :  { %1984 = vmatmul.mubr.msk.bf16.vlgmr.msra.gmra.mxu1 %vm381_vm3, %v1232_v23 }
 0xa65   :  { %1995 = vmatprep.mubr.msk.bf16.mxu1 %vm2105_vm1, %v2104_v20  ;;  %1994 = vmatpush3.bf16.msra.mxu1 %v2051_v11 }
 0xa66   :  { %2011 = vmatprep.subr.bf16.mxu1 %v2104_v20 }
 0xa71   :  { %1282 = vrot.lane.b32.xlu1 %v2331_v12, %s2112_s24 }
 0xae9   :  { %v1227_v24 = vpop.xlane.xlu1 %1226 }
 0xaea   :  { %2094 = vrcp.f32 %v1227_v24 }
 0xaed   :  { %v1283_v25 = vpop.permute.xlu1 %1282 }
 0xaee   :  { %v1288_v26 = vsel %vm409_vm4, %v1283_v25, 0  ;;  %v2061_v25 = vld [vmem:[%s2615_s11 + $0x10] sm:$0xff]  }
 0xaef   :  { %1988 = vmatpush3.bf16.msra.mxu0 %v1288_v26  ;;  %v2062_v26 = vld [vmem:[%s2615_s11 + $0x8] sm:$0xff]  }
 0xaf0   :  { %1999 = vmatprep.subr.bf16.mxu0 %v2104_v20 }
 0xaf7   :  { %v2095_v27 = vpop.eup %2094 }
 0xaf8   :  { %v1231_v28 = vmul.f32 %v2095_v27, %v2091_v18  ;;  %v2063_v27 = vld [vmem:[%s2615_s11] sm:$0xff]  }
 0xafa   :  { %v1233_v31 = vpack.c.bf16 %v1231_v28, %v1231_v28  ;;  %v1773_v28 = vld [vmem:[%s2614_s10] ss:$0 sm:$0xff] }
 0xafc   :  { %1990 = vmatmul.mubr.msk.bf16.vlgmr.msra.gmra.mxu0 %vm381_vm3, %v1233_v31 }
 0xafd   :  { %2007 = vmatprep.mubr.msk.bf16.mxu0 %vm2105_vm1, %v2104_v20  ;;  %2000 = vmatpush3.bf16.msra.mxu0 %v2052_v1 }
 0xafe   :  { %2001 = vmatprep.subr.bf16.mxu0 %v2104_v20 }
 0xb01   :  { %2002 = vmatpush3.bf16.msra.mxu0 %v2053_v2 }
 0xb02   :  { %2003 = vmatprep.subr.bf16.mxu0 %v2104_v20 }
 0xb24   :  { %v1276_v12 = vpop.f32.mrf.mxu1 }
 0xb26   :  { %v1985_v32 = vpop.f32.mrf.mxu1 }
 0xb28   :  { %v1279_v33 = vpop.f32.mrf.mxu1 }
 0xb2a   :  { %v1986_v35 = vpop.f32.mrf.mxu1 }
 0xbbc   :  { %v1324_v30 = vpop.f32.mrf.mxu0 }
 0xbbd   :  { %v1330_v36 = vpack.c.bf16 %v1324_v30, %v1276_v12 }
 0xbbe   :  { %v1991_v37 = vpop.f32.mrf.mxu0 }
 0xbbf   :  { %1996 = vmatmul.mubr.msk.bf16.vlgmr.msra.gmra.mxu1 %vm269_vm2, %v1330_v36 }
 0xbc0   :  { %v1327_v38 = vpop.f32.mrf.mxu0  ;;  %2027 = vmatprep.mubr.msk.bf16.mxu1 %vm2105_vm1, %v2104_v20  ;;  %2012 = vmatpush3.bf16.msra.mxu1 %v2056_v5 }
 0xbc1   :  { %2013 = vmatprep.subr.bf16.mxu1 %v2104_v20 }
 0xbc2   :  { %v1992_v39 = vpop.f32.mrf.mxu0 }
 0xbc4   :  { %2014 = vmatpush3.bf16.msra.mxu1 %v2057_v6  ;;  %v1789_v6 = vld [vmem:[%s2620_s16] ss:$0 sm:$0xff] }
 0xbc5   :  { %2015 = vmatprep.subr.bf16.mxu1 %v2104_v20 }
 0xbc8   :  { %2016 = vmatpush3.bf16.msra.mxu1 %v2058_v7 }
 0xbc9   :  { %2017 = vmatprep.subr.bf16.mxu1 %v2104_v20 }
 0xbcc   :  { %2018 = vmatpush3.bf16.msra.mxu1 %v2059_v8 }
 0xbcd   :  { %2019 = vmatprep.subr.bf16.mxu1 %v2104_v20 }
 0xbd0   :  { %2020 = vmatpush3.bf16.msra.mxu1 %v2060_v9 }
 0xbd1   :  { %2021 = vmatprep.subr.bf16.mxu1 %v2104_v20 }
 0xbd4   :  { %2022 = vmatpush3.bf16.msra.mxu1 %v2061_v25 }
 0xbd5   :  { %2023 = vmatprep.subr.bf16.mxu1 %v2104_v20 }
 0xbd8   :  { %2024 = vmatpush3.bf16.msra.mxu1 %v2062_v26 }
 0xbd9   :  { %2025 = vmatprep.subr.bf16.mxu1 %v2104_v20 }
 0xbdc   :  { %2026 = vmatpush3.bf16.msra.mxu1 %v2063_v27 }
 0xc7f   :  { %v1374_v40 = vpop.f32.mrf.mxu1 }
 0xc80   :  { %v1381_v43 = vadd.f32 %v1374_v40, %v2475_v63 }
 0xc81   :  { %v1997_v44 = vpop.f32.mrf.mxu1 }
 0xc82   :  { %v1390_v46 = vadd.f32 %v1770_v41, %v1381_v43 }
 0xc83   :  { %v1377_v48 = vpop.f32.mrf.mxu1 }
 0xc84   :  { %v2511_v49 = vadd.f32 %v1390_v46, %v2215_v3  ;;  %v1382_v51 = vadd.f32 %v1377_v48, %v2479_v4  ;;  %v2054_v4 = vld [vmem:[%s2613_s9 + $0x8] sm:$0xff]  }
 0xc85   :  { %v1998_v52 = vpop.f32.mrf.mxu1  ;;  %2004 = vmatpush3.bf16.msra.mxu0 %v2054_v4 }
 0xc86   :  { %v1391_v53 = vadd.f32 %v1770_v41, %v1382_v51  ;;  %v1396_v54 = vsel %vm112_vm0, %v2511_v49, 0.0  ;;  %2005 = vmatprep.subr.bf16.mxu0 %v2104_v20  ;;  %v1779_v20 = vld [vmem:[%s2616_s12] ss:$0 sm:$0xff] }
 0xc87   :  { %1397 = vadd.xlane.f32.xlu1 %v1396_v54 }
 0xc88   :  { %v2517_v55 = vadd.f32 %v1391_v53, %v2246_v13 }
 0xc89   :  { %2006 = vmatpush3.bf16.msra.mxu0 %v2055_v34  ;;  %v1788_v34 = vld [vmem:[%s2619_s15] ss:$0 sm:$0xff] }
 0xc8a   :  { %v1399_v42 = vsel %vm112_vm0, %v2517_v55, 0.0 }
 0xc8b   :  { %1400 = vadd.xlane.f32.xlu0 %v1399_v42 }
 0xd10   :  { %v1398_v56 = vpop.xlane.xlu1 %1397 }
 0xd11   :  { %v1403_v57 = vmul.f32 0.015625, %v1398_v56 }
 0xd13   :  { %v1405_v3 = vsub.f32 %v2511_v49, %v1403_v57 }
 0xd14   :  { %v1401_v58 = vpop.xlane.xlu0 %1400 }
 0xd15   :  { %v1404_v59 = vmul.f32 0.015625, %v1401_v58  ;;  %v1407_v60 = vmul.f32 %v1405_v3, %v1405_v3 }
 0xd17   :  { %v1406_v61 = vsub.f32 %v2517_v55, %v1404_v59  ;;  %v1409_v63 = vsel %vm112_vm0, %v1407_v60, 0.0 }
 0xd18   :  { %1410 = vadd.xlane.f32.xlu0 %v1409_v63 }
 0xd19   :  { %v1408_v29 = vmul.f32 %v1406_v61, %v1406_v61 }
 0xd1b   :  { %v1412_v13 = vsel %vm112_vm0, %v1408_v29, 0.0 }
 0xd1c   :  { %1413 = vadd.xlane.f32.xlu1 %v1412_v13 }
 0xda1   :  { %v1411_v45 = vpop.xlane.xlu0 %1410 }
 0xda2   :  { %v1415_v62 = vmul.f32 0.015625, %v1411_v45 }
 0xda4   :  { %v1417_v10 = vadd.f32 1e-05, %v1415_v62 }
 0xda5   :  { %v1414_v14 = vpop.xlane.xlu1 %1413 }
 0xda6   :  { %2096 = vrsqrt.f32 %v1417_v10  ;;  %v1416_v47 = vmul.f32 0.015625, %v1414_v14 }
 0xda8   :  { %v1418_v0 = vadd.f32 1e-05, %v1416_v47 }
 0xdaa   :  { %2098 = vrsqrt.f32 %v1418_v0 }
 0xdb3   :  { %v2097_v15 = vpop.eup %2096 }
 0xdb4   :  { %v1421_v16 = vmul.f32 %v2097_v15, %v1405_v3 }
 0xdb6   :  { %v1429_v19 = vmul.f32 %v1771_v17, %v1421_v16 }
 0xdb7   :  { %v2099_v50 = vpop.eup %2098 }
 0xdb8   :  { %v1422_v18 = vmul.f32 %v2099_v50, %v1406_v61  ;;  %v1437_v23 = vadd.f32 %v1772_v21, %v1429_v19 }
 0xdba   :  { %v1430_v22 = vmul.f32 %v1771_v17, %v1422_v18 }
 0xdbc   :  { %v1438_v11 = vadd.f32 %v1772_v21, %v1430_v22 }
 0xdbe   :  { %v1439_v24 = vpack.c.bf16 %v1438_v11, %v1437_v23 }
 0xdc0   :  { %2008 = vmatmul.mubr.msk.bf16.vlgmr.msra.gmra.mxu0 %vm112_vm0, %v1439_v24 }
 0xe80   :  { %v1516_v31 = vpop.f32.mrf.mxu0 }
 0xe81   :  { %v1517_v32 = vadd.f32 %v1773_v28, %v1516_v31 }
 0xe82   :  { %v2009_v12 = vpop.f32.mrf.mxu0 }
 0xe83   :  { %v1523_v36 = vmax.f32 %v1517_v32, 0.0 }
 0xe84   :  { %v1519_v33 = vpop.f32.mrf.mxu0 }
 0xe85   :  { %v1520_v35 = vadd.f32 %v1773_v28, %v1519_v33 }
 0xe86   :  { %v2010_v30 = vpop.f32.mrf.mxu0 }
 0xe87   :  { %v1524_v37 = vmax.f32 %v1520_v35, 0.0 }
 0xe89   :  { %v1525_v38 = vpack.c.bf16 %v1524_v37, %v1523_v36 }
 0xe8b   :  { %2028 = vmatmul.mubr.bf16.vlgmr.msra.gmra.mxu1 %v1525_v38 }
 0xf4b   :  { %v1631_v39 = vpop.f32.mrf.mxu1 }
 0xf4c   :  { %v1632_v40 = vadd.f32 %v1779_v20, %v1631_v39 }
 0xf4d   :  { %v2029_v41 = vpop.f32.mrf.mxu1 }
 0xf4e   :  { %v1638_v43 = vadd.f32 %v1632_v40, %v2511_v49 }
 0xf4f   :  { %v1634_v44 = vpop.f32.mrf.mxu1 }
 0xf50   :  { %v1635_v46 = vadd.f32 %v1779_v20, %v1634_v44  ;;  %v1642_v48 = vsel %vm112_vm0, %v1638_v43, 0.0 }
 0xf51   :  { %1643 = vadd.xlane.f32.xlu0 %v1642_v48  ;;  %v2030_v51 = vpop.f32.mrf.mxu1 }
 0xf52   :  { %v1639_v52 = vadd.f32 %v1635_v46, %v2517_v55 }
 0xf54   :  { %v1645_v53 = vsel %vm112_vm0, %v1639_v52, 0.0 }
 0xf55   :  { %1646 = vadd.xlane.f32.xlu1 %v1645_v53 }
 0xfda   :  { %v1644_v54 = vpop.xlane.xlu0 %1643 }
 0xfdb   :  { %v1648_v42 = vmul.f32 0.015625, %v1644_v54 }
 0xfdd   :  { %v1650_v56 = vsub.f32 %v1638_v43, %v1648_v42 }
 0xfde   :  { %v1647_v57 = vpop.xlane.xlu1 %1646 }
 0xfdf   :  { %v1649_v3 = vmul.f32 0.015625, %v1647_v57  ;;  %v1652_v58 = vmul.f32 %v1650_v56, %v1650_v56 }
 0xfe1   :  { %v1651_v59 = vsub.f32 %v1639_v52, %v1649_v3  ;;  %v1654_v49 = vsel %vm112_vm0, %v1652_v58, 0.0 }
 0xfe2   :  { %1655 = vadd.xlane.f32.xlu0 %v1654_v49 }
 0xfe3   :  { %v1653_v60 = vmul.f32 %v1651_v59, %v1651_v59 }
 0xfe5   :  { %v1657_v61 = vsel %vm112_vm0, %v1653_v60, 0.0 }
 0xfe6   :  { %1658 = vadd.xlane.f32.xlu1 %v1657_v61 }
0x106b   :  { %v1656_v63 = vpop.xlane.xlu0 %1655 }
0x106c   :  { %v1660_v29 = vmul.f32 0.015625, %v1656_v63 }
0x106e   :  { %v1662_v55 = vadd.f32 1e-05, %v1660_v29 }
0x106f   :  { %v1659_v13 = vpop.xlane.xlu1 %1658 }
0x1070   :  { %2100 = vrsqrt.f32 %v1662_v55  ;;  %v1661_v1 = vmul.f32 0.015625, %v1659_v13 }
0x1072   :  { %v1663_v2 = vadd.f32 1e-05, %v1661_v1 }
0x1074   :  { %2102 = vrsqrt.f32 %v1663_v2 }
0x107d   :  { %v2101_v4 = vpop.eup %2100 }
0x107e   :  { %v1666_v5 = vmul.f32 %v2101_v4, %v1650_v56 }
0x1080   :  { %v1674_v7 = vmul.f32 %v1788_v34, %v1666_v5 }
0x1081   :  { %v2103_v8 = vpop.eup %2102 }
0x1082   :  { %v1682_v9 = vadd.f32 %v1789_v6, %v1674_v7  ;;  %v1667_v45 = vmul.f32 %v2103_v8, %v1651_v59 }
0x1084   :  { %1684 = vst.msk [vmem:[#allocation2] sm:$0xff] %vm112_vm0, %v1682_v9  ;;  %v1675_v62 = vmul.f32 %v1788_v34, %v1667_v45 }
0x1086   :  { %v1683_v10 = vadd.f32 %v1789_v6, %v1675_v62 }
0x1088   :  { %1685 = vst.msk [vmem:[#allocation2 + $0x8] sm:$0xff] %vm112_vm0, %v1683_v10 }
0x108b   :  { %v1718_v14 = vld [vmem:[#allocation2] sm:$0xff] }
0x108c   :  { %1719 = vst [vmem:[%s2621_s17] sm:$0xff] %v1718_v14 }
0x108f   :  { %v1720_v47 = vld [vmem:[#allocation2 + $0x8] sm:$0xff] }
0x1090   :  { %1721 = vst [vmem:[%s2621_s17 + $0x10] sm:$0xff] %v1720_v47 }

</bundles_post_ra>
